<compile_context>
chip_gen: v6e
topology: v6e:2x2x1
jax: 0.10.0
libtpu: 0.0.40
codegen_flags: <defaults>
</compile_context>

<pallas_src>
import functools

import numpy as np
import jax
import jax.numpy as jnp
from jax.experimental import pallas as pl
from jax.experimental.pallas import tpu as pltpu

LEAK = 0.01  # nn.LeakyReLU default negative_slope
VMEM_LIMIT = 32 * 1024 * 1024

ANCHORS = jnp.array(
    [[10, 13], [16, 30], [33, 23], [30, 61], [62, 45],
     [59, 119], [116, 90], [156, 198], [373, 326]], dtype=jnp.float32)


def _round_up(a, m):
    return ((a + m - 1) // m) * m


def _pick_tm(M):
    for t in (512, 256, 128):
        if M % t == 0:
            return t
    return M


def _pick_tn(N):
    for t in (256, 128):
        if N % t == 0:
            return t
    return N


def _pick_tk(K):
    if K <= 2304:
        return K
    for t in (2304, 2048, 1024, 512, 256, 128):
        if K % t == 0:
            return t
    return K


# ---------------------------------------------------------------------------
# Pallas kernel: tiled matmul + fused affine / LeakyReLU / residual epilogue
#   modes: 'act' -> leaky(acc*s + b)
#          'lin' -> acc*s + b
#          'res' -> (z = leaky(acc + skip)) * s + b      (residual tail fusion)
# ---------------------------------------------------------------------------
def _make_mm_kernel(mode):
    def kernel(*refs):
        if mode == 'res':
            x_ref, w_ref, s_ref, b_ref, k_ref, o_ref, acc_ref = refs
        else:
            x_ref, w_ref, s_ref, b_ref, o_ref, acc_ref = refs

        @pl.when(pl.program_id(2) == 0)
        def _init():
            acc_ref[...] = jnp.zeros_like(acc_ref)

        acc_ref[...] += jnp.dot(x_ref[...].astype(jnp.bfloat16), w_ref[...],
                                preferred_element_type=jnp.float32)

        @pl.when(pl.program_id(2) == pl.num_programs(2) - 1)
        def _fin():
            y = acc_ref[...]
            s = s_ref[...]
            b = b_ref[...]
            if mode == 'res':
                z = y + k_ref[...].astype(jnp.float32)
                z = jnp.where(z > 0, z, LEAK * z)
                y = z * s + b
            else:
                y = y * s + b
                if mode == 'act':
                    y = jnp.where(y > 0, y, LEAK * y)
            o_ref[...] = y.astype(o_ref.dtype)
    return kernel


@functools.lru_cache(maxsize=None)
def _build_mm_call(M, K, N, tm, tk, tn, mode, x_dtype, out_dtype):
    in_specs = [
        pl.BlockSpec((tm, tk), lambda i, j, k: (i, k)),
        pl.BlockSpec((tk, tn), lambda i, j, k: (k, j)),
        pl.BlockSpec((1, tn), lambda i, j, k: (0, j)),
        pl.BlockSpec((1, tn), lambda i, j, k: (0, j)),
    ]
    if mode == 'res':
        in_specs.append(pl.BlockSpec((tm, tn), lambda i, j, k: (i, j)))
    flops = 2 * M * N * K
    bytes_acc = int(M * K * np.dtype(x_dtype).itemsize + K * N * 2 +
                    M * N * np.dtype(out_dtype).itemsize)
    return pl.pallas_call(
        _make_mm_kernel(mode),
        out_shape=jax.ShapeDtypeStruct((M, N), out_dtype),
        grid_spec=pltpu.PrefetchScalarGridSpec(
            num_scalar_prefetch=0,
            grid=(M // tm, N // tn, K // tk),
            in_specs=in_specs,
            out_specs=pl.BlockSpec((tm, tn), lambda i, j, k: (i, j)),
            scratch_shapes=[pltpu.VMEM((tm, tn), jnp.float32)],
        ),
        compiler_params=pltpu.CompilerParams(
            dimension_semantics=("parallel", "parallel", "arbitrary"),
            vmem_limit_bytes=VMEM_LIMIT),
        cost_estimate=pl.CostEstimate(flops=flops, transcendentals=0,
                                      bytes_accessed=bytes_acc),
    )


def mm_affine(x, w, scale, bias, mode, skip=None, out_dtype=jnp.bfloat16):
    """out = epilogue((x @ w)) with no activation padding / output slicing."""
    M, K = x.shape
    N = w.shape[1]
    tk, tn = _pick_tk(K), _pick_tn(N)
    tm = _pick_tm(M)
    slice_m = None
    if tm == M and M > 1024:        # awkward large M: pad (never hit in demo)
        Mp = _round_up(M, 512)
        x = jnp.pad(x, ((0, Mp - M), (0, 0)))
        if skip is not None:
            skip = jnp.pad(skip, ((0, Mp - M), (0, 0)))
        slice_m, M, tm = M, Mp, 512
    call = _build_mm_call(M, K, N, tm, tk, tn, mode,
                          np.dtype(x.dtype), np.dtype(out_dtype))
    args = (x, w, scale, bias) + ((skip,) if mode == 'res' else ())
    out = call(*args)
    if slice_m is not None:
        out = out[:slice_m]
    return out


# ---------------------------------------------------------------------------
# Pallas kernel: fused 3x3 stride-1 conv (im2col-free).
# Grid = (batch, N-tiles).  The spatially padded NHWC image block stays in VMEM
# and the 9 taps are accumulated on the MXU inside the kernel.
# ---------------------------------------------------------------------------
def _make_conv3_kernel(H, W, Cin, tn, mode):
    def kernel(*refs):
        if mode == 'res':
            x_ref, w_ref, s_ref, b_ref, skip_ref, o_ref, acc_ref = refs
        else:
            x_ref, w_ref, s_ref, b_ref, o_ref, acc_ref = refs
        acc_ref[...] = jnp.zeros_like(acc_ref)
        for t in range(9):
            dh, dw = divmod(t, 3)
            xt = x_ref[dh:dh + H, dw:dw + W, :]
            xt = xt.reshape(H * W, Cin).astype(jnp.bfloat16)
            acc_ref[...] += jnp.dot(xt, w_ref[t],
                                    preferred_element_type=jnp.float32)
        y = acc_ref[...]
        s = s_ref[...]
        b = b_ref[...]
        if mode == 'res':
            z = y + skip_ref[...].reshape(H * W, tn).astype(jnp.float32)
            z = jnp.where(z > 0, z, LEAK * z)
            y = z * s + b
        else:
            y = y * s + b
            if mode == 'act':
                y = jnp.where(y > 0, y, LEAK * y)
        o_ref[...] = y.reshape(H, W, tn).astype(o_ref.dtype)
    return kernel


@functools.lru_cache(maxsize=None)
def _build_conv3_call(B, H, W, Cin, Cout, tn, mode, out_dtype):
    in_specs = [
        pl.BlockSpec((None, H + 2, W + 2, Cin), lambda b, j: (b, 0, 0, 0)),
        pl.BlockSpec((9, Cin, tn), lambda b, j: (0, 0, j)),
        pl.BlockSpec((1, tn), lambda b, j: (0, j)),
        pl.BlockSpec((1, tn), lambda b, j: (0, j)),
    ]
    if mode == 'res':
        in_specs.append(pl.BlockSpec((None, H, W, tn), lambda b, j: (b, 0, 0, j)))
    flops = 2 * B * H * W * 9 * Cin * Cout
    bytes_acc = int(B * (H + 2) * (W + 2) * Cin * 2 + 9 * Cin * Cout * 2 +
                    B * H * W * Cout * np.dtype(out_dtype).itemsize)
    return pl.pallas_call(
        _make_conv3_kernel(H, W, Cin, tn, mode),
        out_shape=jax.ShapeDtypeStruct((B, H, W, Cout), out_dtype),
        grid_spec=pltpu.PrefetchScalarGridSpec(
            num_scalar_prefetch=0,
            grid=(B, Cout // tn),
            in_specs=in_specs,
            out_specs=pl.BlockSpec((None, H, W, tn), lambda b, j: (b, 0, 0, j)),
            scratch_shapes=[pltpu.VMEM((H * W, tn), jnp.float32)],
        ),
        compiler_params=pltpu.CompilerParams(
            dimension_semantics=("parallel", "parallel"),
            vmem_limit_bytes=VMEM_LIMIT),
        cost_estimate=pl.CostEstimate(flops=flops, transcendentals=0,
                                      bytes_accessed=bytes_acc),
    )


def _use_fused3(H, W, Cin, Cout):
    if (H % 8) or (W % 8) or Cin < 16:
        return False
    tn = _pick_tn(Cout)
    need = (2 * (H + 2) * (W + 2) * Cin * 2 + 2 * 9 * Cin * tn * 2 +
            2 * H * W * tn * 4 + H * W * tn * 4 + 2 * H * W * tn * 2)
    return need < 24 * 1024 * 1024   # safe for v7x's smaller VMEM too


def conv3x3_s1(x, p, mode, skip, out_dtype):
    B, H, W, Cin = x.shape
    Cout = p['w'].shape[-1]
    tn = _pick_tn(Cout)
    xp = jnp.pad(x, ((0, 0), (1, 1), (1, 1), (0, 0)))
    call = _build_conv3_call(B, H, W, Cin, Cout, tn, mode, np.dtype(out_dtype))
    args = (xp, p['w'], p['scale'], p['bias'])
    if mode == 'res':
        args = args + (skip,)
    return call(*args)


# ---------------------------------------------------------------------------
# Pallas kernel: sigmoid + masked squared-sum (lane-dense layout)
# ---------------------------------------------------------------------------
def _sigmoid_mask_kernel(x_ref, m_ref, sx_ref, ps_ref):
    x = x_ref[...]
    sx = 1.0 / (1.0 + jnp.exp(-x))
    sx_ref[...] = sx
    ps_ref[...] = jnp.sum(m_ref[...] * sx * sx, axis=1, keepdims=True)


def sigmoid_masked_sqsum(x4d, m4d):
    """Returns (sigmoid(x), sum over mask of sigmoid(x)^2)."""
    shape = x4d.shape
    n = int(np.prod(shape))
    rows = max(_round_up(-(-n // 128), 8), 8)
    tot = rows * 128
    xf = jnp.pad(x4d.reshape(-1), (0, tot - n)).reshape(rows, 128)
    mf = jnp.pad(m4d.reshape(-1), (0, tot - n)).reshape(rows, 128)
    sx, ps = pl.pallas_call(
        _sigmoid_mask_kernel,
        out_shape=(jax.ShapeDtypeStruct((rows, 128), jnp.float32),
                   jax.ShapeDtypeStruct((rows, 1), jnp.float32)),
    )(xf, mf)
    sig = sx.reshape(-1)[:n].reshape(shape)
    return sig, jnp.sum(ps)


# ---------------------------------------------------------------------------
# Conv / network glue (NHWC, bf16 activations)
# ---------------------------------------------------------------------------
def im2col(x, k, stride, pad):
    B, H, W, Cin = x.shape
    Ho = (H + 2 * pad - k) // stride + 1
    Wo = (W + 2 * pad - k) // stride + 1
    if k == 1 and stride == 1 and pad == 0:
        return x.reshape(B * H * W, Cin), Ho, Wo
    xp = jnp.pad(x, ((0, 0), (pad, pad), (pad, pad), (0, 0)))
    cols = []
    for dh in range(k):
        for dw in range(k):
            cols.append(xp[:, dh:dh + stride * Ho:stride,
                           dw:dw + stride * Wo:stride, :])
    patches = jnp.concatenate(cols, axis=-1)
    return patches.reshape(B * Ho * Wo, k * k * Cin), Ho, Wo


def cbl(x, p, stride=1, mode='act', skip=None, out_dtype=jnp.bfloat16):
    """conv (bias=False) + folded-BN affine + optional LeakyReLU / residual tail."""
    k = p['k']
    B, H, W, Cin = x.shape
    if k == 1:                                             # 1x1, stride 1
        M = B * H * W
        skip2 = None if skip is None else skip.reshape(M, -1)
        out = mm_affine(x.reshape(M, Cin), p['w'], p['scale'], p['bias'],
                        mode, skip2, out_dtype)
        return out.reshape(B, H, W, -1)
    pad = (k - 1) // 2
    if stride == 1 and k == 3 and _use_fused3(H, W, Cin, p['w'].shape[-1]):
        return conv3x3_s1(x, p, mode, skip, out_dtype)
    cols, Ho, Wo = im2col(x, k, stride, pad)               # strided / tiny convs
    w2 = p['w'].reshape(k * k * Cin, -1)
    skip2 = None if skip is None else skip.reshape(B * Ho * Wo, -1)
    out = mm_affine(cols, w2, p['scale'], p['bias'], mode, skip2, out_dtype)
    return out.reshape(B, Ho, Wo, -1)


def residual(x, p):
    y = cbl(x, p['c1'], 1, mode='act')        # 1x1 conv + BN_mid + LeakyReLU
    # 3x3 conv, then fused: BN_out(LeakyReLU(x + conv(y)))
    return cbl(y, p['c2'], 1, mode='res', skip=x)


def upsample2(x):  # nearest, scale_factor=2 (NHWC), via broadcast (no repeats)
    B, H, W, C = x.shape
    x = jnp.broadcast_to(x[:, :, None, :, None, :], (B, H, 2, W, 2, C))
    return x.reshape(B, 2 * H, 2 * W, C)


# ---------------------------------------------------------------------------
# YOLO head (loss) glue
# ---------------------------------------------------------------------------
def iou_index(w, h):
    aw, ah = ANCHORS[:, 0], ANCHORS[:, 1]
    A = (aw + 1.0) * (ah + 1.0)
    Bv = (w + 1.0) * (h + 1.0)
    cm = (jnp.minimum(aw[None, :], w[:, None]) + 1.0) * \
         (jnp.minimum(ah[None, :], h[:, None]) + 1.0)
    iou = cm / (A[None, :] + Bv[:, None] - cm)
    iou = jnp.where(iou < 0, 0.0, iou)
    return jnp.argmax(iou, axis=1).astype(jnp.int32)


def yolo_loss(x_nchw, boxes, index, s_index, e_index, S, C, img_size,
              lambda_coord, lambda_noobj):
    Bsz, Ntot = x_nchw.shape[0], x_nchw.shape[1]
    nC5 = 5 + C
    check = jnp.zeros((Bsz, Ntot, S, S), dtype=bool)
    check = check.at[:, 0].set(True).at[:, nC5].set(True).at[:, 2 * nC5].set(True)

    have_boxes = boxes.shape[0] != 0
    if have_boxes:
        val = (index >= s_index) & (index <= e_index)
        valf = val.astype(jnp.float32)
        now_index = jnp.clip(index - s_index, 0, 2)
        div = img_size / S
        b_idx = boxes[:, 0].astype(jnp.int32)
        ix = (boxes[:, 2] / div).astype(jnp.int32)
        iy = (boxes[:, 3] / div).astype(jnp.int32)
        ax = (boxes[:, 2] - ix.astype(jnp.float32) * div) / div
        ay = (boxes[:, 3] - iy.astype(jnp.float32) * div) / div
        ch = now_index * nC5
        safe_b = jnp.where(val, b_idx, Bsz + 1)             # OOB -> dropped
        check = check.at[safe_b, ch, ix, iy].set(False, mode='drop')

    sx, noobj = sigmoid_masked_sqsum(x_nchw, check.astype(jnp.float32))
    loss = lambda_noobj * noobj

    if have_boxes:
        nb = boxes.shape[0]
        nowx = sx[b_idx[:, None], jnp.arange(Ntot)[None, :],
                  ix[:, None], iy[:, None]]                  # [nb, Ntot]
        nowx = nowx.T                                        # [Ntot, nb]
        bi = jnp.arange(nb)
        conf = nowx[ch, bi]
        rax = nowx[ch + 1, bi]
        ray = nowx[ch + 2, bi]
        rw = ANCHORS[index, 0] * jnp.exp(4.0 * nowx[ch + 3, bi] - 2.0)
        rh = ANCHORS[index, 1] * jnp.exp(4.0 * nowx[ch + 4, bi] - 2.0)
        hot = jax.nn.one_hot(boxes[:, 1].astype(jnp.int32), C, dtype=jnp.float32)
        label = nowx[ch[:, None] + 5 + jnp.arange(C)[None, :], bi[:, None]]
        loss = loss + lambda_coord * jnp.sum(valf * (conf - 1.0) ** 2)
        loss = loss + jnp.sum(valf[:, None] * (label - hot) ** 2)
        loss = loss + jnp.sum(valf * (rax - ax) ** 2)
        loss = loss + jnp.sum(valf * (ray - ay) ** 2)
        loss = loss + jnp.sum(valf * (rw / img_size - boxes[:, 4] / img_size) ** 2)
        loss = loss + jnp.sum(valf * (rh / img_size - boxes[:, 5] / img_size) ** 2)
    return loss


# ---------------------------------------------------------------------------
# Parameters (weights pre-packed / pre-cast once: bf16, MXU-ready layouts)
# ---------------------------------------------------------------------------
def build_params(key, C):
    N = 3 * (5 + C)
    keys = iter(jax.random.split(key, 4096))

    def nk():
        return next(keys)

    def folded_bn(cout):
        gamma = 1.0 + 0.1 * jax.random.normal(nk(), (cout,), jnp.float32)
        beta = 0.1 * jax.random.normal(nk(), (cout,), jnp.float32)
        mean = 0.1 * jax.random.normal(nk(), (cout,), jnp.float32)
        var = 1.0 + 0.1 * jnp.abs(jax.random.normal(nk(), (cout,), jnp.float32))
        scale = gamma / jnp.sqrt(var + 1e-5)
        return scale, beta - mean * scale

    def conv_w(cin, cout, k):
        return jax.random.normal(nk(), (k, k, cin, cout), jnp.float32) * \
            np.sqrt(2.0 / (k * k * cin))

    def pack(w4, scale, bias, k, cin, cout):
        if k == 1:
            wp = w4.reshape(cin, cout).astype(jnp.bfloat16)
        else:
            wp = w4.reshape(k * k, cin, cout).astype(jnp.bfloat16)
        return {'k': k, 'w': wp,
                'scale': scale.reshape(1, cout).astype(jnp.float32),
                'bias': bias.reshape(1, cout).astype(jnp.float32)}

    def cbn(cin, cout, k):
        scale, bias = folded_bn(cout)
        return pack(conv_w(cin, cout, k), scale, bias, k, cin, cout)

    def cplain(cin, cout, k):
        return pack(conv_w(cin, cout, k), jnp.ones((cout,), jnp.float32),
                    jnp.zeros((cout,), jnp.float32), k, cin, cout)

    def res(cin, cmid, cout):
        out_scale, out_bias = folded_bn(cout)
        c2 = pack(conv_w(cmid, cout, 3), out_scale, out_bias, 3, cmid, cout)
        return {'c1': cbn(cin, cmid, 1), 'c2': c2}

    P = {}
    P['conv1'] = [cbn(3, 32, 3), cbn(32, 64, 3)]
    P['res1'] = [res(64, 32, 64)]
    P['conv2'] = [cbn(64, 128, 3)]
    P['res2'] = [res(128, 64, 128) for _ in range(2)]
    P['conv3'] = [cbn(128, 256, 3)]
    P['res3'] = [res(256, 128, 256) for _ in range(8)]
    P['conv4'] = [cbn(256, 512, 3)]
    P['res4'] = [res(512, 256, 512) for _ in range(8)]
    P['conv5'] = [cbn(512, 1024, 3)]
    P['res5'] = [res(1024, 512, 1024) for _ in range(4)]
    P['y1c1'] = [cbn(1024, 512, 1), cbn(512, 1024, 3), cbn(1024, 512, 1),
                 cbn(512, 1024, 3), cbn(1024, 512, 1)]
    P['y1c2'] = [cbn(512, 1024, 3), cplain(1024, N, 1)]
    P['y2c1'] = [cbn(512, 256, 1)]
    P['merge2'] = [cbn(512, 256, 1)]
    P['y2c2'] = [cbn(512, 256, 1), cbn(256, 512, 3), cbn(512, 256, 1),
                 cbn(256, 512, 3), cbn(512, 256, 1)]
    P['y2c3'] = [cbn(256, 512, 3), cplain(512, N, 1)]
    P['y3c1'] = [cbn(256, 128, 1)]
    P['merge3'] = [cbn(256, 128, 1)]
    P['y3c2'] = [cbn(256, 128, 1), cbn(128, 256, 3), cbn(256, 128, 1),
                 cbn(128, 256, 3), cbn(256, 128, 1)]
    P['y3c3'] = [cbn(128, 256, 3), cplain(256, N, 1)]
    return P


# ---------------------------------------------------------------------------
# Full YoloV3 forward
# ---------------------------------------------------------------------------
def yolov3_forward(P, x_nchw, boxes, C, img_size,
                   lambda_coord=5.0, lambda_noobj=0.5):
    if boxes.shape[0] != 0:
        index = iou_index(boxes[:, 4], boxes[:, 5])
    else:
        index = jnp.zeros((0,), jnp.int32)

    x = jnp.transpose(x_nchw, (0, 2, 3, 1)).astype(jnp.bfloat16)  # NCHW -> NHWC

    x = cbl(x, P['conv1'][0], 1)
    x = cbl(x, P['conv1'][1], 2)
    x = residual(x, P['res1'][0])
    x = cbl(x, P['conv2'][0], 2)
    for rp in P['res2']:
        x = residual(x, rp)
    x3 = cbl(x, P['conv3'][0], 2)
    x = x3
    for rp in P['res3']:
        x = residual(x, rp)
    x2 = cbl(x, P['conv4'][0], 2)
    x = x2
    for rp in P['res4']:
        x = residual(x, rp)
    x = cbl(x, P['conv5'][0], 2)
    for rp in P['res5']:
        x = residual(x, rp)
    x1 = x

    # head 1
    y1_1 = x1
    for p in P['y1c1']:
        y1_1 = cbl(y1_1, p, 1)
    y1 = cbl(y1_1, P['y1c2'][0], 1)
    y1 = cbl(y1, P['y1c2'][1], 1, mode='lin', out_dtype=jnp.float32)
    y1_nchw = jnp.transpose(y1, (0, 3, 1, 2))
    S1 = y1_nchw.shape[2]
    loss1 = yolo_loss(y1_nchw, boxes, index, 6, 8, S1, C, img_size,
                      lambda_coord, lambda_noobj)

    # head 2
    y2_1 = cbl(y1_1, P['y2c1'][0], 1)
    y2_1 = upsample2(y2_1)
    x2m = cbl(x2, P['merge2'][0], 1)
    y2_1 = jnp.concatenate([y2_1, x2m], axis=-1)
    y2_2 = y2_1
    for p in P['y2c2']:
        y2_2 = cbl(y2_2, p, 1)
    y2 = cbl(y2_2, P['y2c3'][0], 1)
    y2 = cbl(y2, P['y2c3'][1], 1, mode='lin', out_dtype=jnp.float32)
    y2_nchw = jnp.transpose(y2, (0, 3, 1, 2))
    S2 = y2_nchw.shape[2]
    loss2 = yolo_loss(y2_nchw, boxes, index, 3, 5, S2, C, img_size,
                      lambda_coord, lambda_noobj)

    # head 3
    y3_1 = cbl(y2_2, P['y3c1'][0], 1)
    y3_1 = upsample2(y3_1)
    x3m = cbl(x3, P['merge3'][0], 1)
    y3_1 = jnp.concatenate([y3_1, x3m], axis=-1)
    y3 = y3_1
    for p in P['y3c2']:
        y3 = cbl(y3, p, 1)
    y3 = cbl(y3, P['y3c3'][0], 1)
    y3 = cbl(y3, P['y3c3'][1], 1, mode='lin', out_dtype=jnp.float32)
    y3_nchw = jnp.transpose(y3, (0, 3, 1, 2))
    S3 = y3_nchw.shape[2]
    loss3 = yolo_loss(y3_nchw, boxes, index, 0, 2, S3, C, img_size,
                      lambda_coord, lambda_noobj)

    loss = jnp.reshape(loss1 + loss2 + loss3, (1,))
    return loss, y1_nchw, y2_nchw, y3_nchw


# ---------------------------------------------------------------------------
if __name__ == "__main__":
    key = jax.random.PRNGKey(0)
    kp, kx = jax.random.split(key)

    C = 4                       # number of classes (small)
    img_size = 64               # small image; heads at S = 2, 4, 8
    Bsz = 2

    params = build_params(kp, C)
    x = jax.random.normal(kx, (Bsz, 3, img_size, img_size), jnp.float32)

    # boxes: [batch_index, class, x, y, w, h]  (w/h chosen to hit all 3 heads)
    boxes = jnp.array([
        [0.0, 1.0, 10.0, 20.0, 12.0, 15.0],    # small   -> yolo3
        [1.0, 2.0, 40.0, 30.0, 60.0, 50.0],    # medium  -> yolo2
        [0.0, 3.0, 33.0, 50.0, 150.0, 200.0],  # large   -> yolo1
        [1.0, 0.0, 5.0, 60.0, 370.0, 320.0],   # largest -> yolo1
    ], dtype=jnp.float32)

    loss, y1, y2, y3 = yolov3_forward(params, x, boxes, C, img_size)
    jax.block_until_ready((loss, y1, y2, y3))

    if not bool(jnp.all(jnp.isfinite(loss))):
        raise Exception("INF/NAN")
    print("KERNEL_OK")
</pallas_src>

<mosaic_0001>
module attributes {stable_mosaic.version = 11 : i64} {
  func.func @kernel(%arg0: i32, %arg1: i32, %arg2: i32, %arg3: memref<512x27xbf16, #tpu.memory_space<vmem>>, %arg4: memref<27x32xbf16, #tpu.memory_space<vmem>>, %arg5: memref<1x32xf32, #tpu.memory_space<vmem>>, %arg6: memref<1x32xf32, #tpu.memory_space<vmem>>, %arg7: memref<512x32xbf16, #tpu.memory_space<vmem>>, %arg8: memref<512x32xf32, #tpu.memory_space<vmem>>) attributes {dimension_semantics = [#tpu.dimension_semantics<parallel>, #tpu.dimension_semantics<parallel>, #tpu.dimension_semantics<arbitrary>], iteration_bounds = array<i64: 16, 1, 1>, scalar_prefetch = 0 : i64, scratch_operands = 1 : i64, tpu.core_type = #tpu.core_type<tc>, window_params = [{transform_indices = @transform_0, window_bounds = array<i64: 512, 27>}, {transform_indices = @transform_1, window_bounds = array<i64: 27, 32>}, {transform_indices = @transform_2, window_bounds = array<i64: 1, 32>}, {transform_indices = @transform_3, window_bounds = array<i64: 1, 32>}, {transform_indices = @transform_4, window_bounds = array<i64: 512, 32>}]} {
    %c0_i32 = arith.constant 0 : i32
    %0 = arith.cmpi eq, %arg2, %c0_i32 : i32
    %1 = arith.extui %0 : i1 to i32
    %c0_i32_0 = arith.constant 0 : i32
    %2 = arith.cmpi ne, %1, %c0_i32_0 : i32
    scf.if %2 {
      %cst_10 = arith.constant 0.000000e+00 : f32
      %12 = vector.broadcast %cst_10 : f32 to vector<512x32xf32>
      %c0_11 = arith.constant 0 : index
      %c0_12 = arith.constant 0 : index
      %13 = vector.load %arg8[%c0_11, %c0_12] : memref<512x32xf32, #tpu.memory_space<vmem>>, vector<512x32xf32>
      tpu.vector_store %arg8[%c0_11, %c0_12], %12 {strides = array<i32>} : memref<512x32xf32, #tpu.memory_space<vmem>>, vector<512x32xf32>,
    } else {
    }
    %c0 = arith.constant 0 : index
    %c0_1 = arith.constant 0 : index
    %3 = vector.load %arg8[%c0, %c0_1] : memref<512x32xf32, #tpu.memory_space<vmem>>, vector<512x32xf32>
    %c0_2 = arith.constant 0 : index
    %c0_3 = arith.constant 0 : index
    %4 = vector.load %arg3[%c0_2, %c0_3] : memref<512x27xbf16, #tpu.memory_space<vmem>>, vector<512x27xbf16>
    %c0_4 = arith.constant 0 : index
    %c0_5 = arith.constant 0 : index
    %5 = vector.load %arg4[%c0_4, %c0_5] : memref<27x32xbf16, #tpu.memory_space<vmem>>, vector<27x32xbf16>
    %cst = arith.constant dense<0.000000e+00> : vector<512x32xf32>
    %6 = tpu.matmul %4, %5, %cst {dimension_numbers = #tpu.dot_dimension_numbers<[1], [0], [0], [1], [0, 0, 1, 1], [], []>} : vector<512x27xbf16>, vector<27x32xbf16>, vector<512x32xf32> -> vector<512x32xf32>
    %7 = arith.addf %3, %6 : vector<512x32xf32>
    %c0_6 = arith.constant 0 : index
    %c0_7 = arith.constant 0 : index
    %8 = vector.load %arg8[%c0_6, %c0_7] : memref<512x32xf32, #tpu.memory_space<vmem>>, vector<512x32xf32>
    tpu.vector_store %arg8[%c0_6, %c0_7], %7 {strides = array<i32>} : memref<512x32xf32, #tpu.memory_space<vmem>>, vector<512x32xf32>,
    %c0_i32_8 = arith.constant 0 : i32
    %9 = arith.cmpi eq, %arg2, %c0_i32_8 : i32
    %10 = arith.extui %9 : i1 to i32
    %c0_i32_9 = arith.constant 0 : i32
    %11 = arith.cmpi ne, %10, %c0_i32_9 : i32
    scf.if %11 {
      %c0_10 = arith.constant 0 : index
      %c0_11 = arith.constant 0 : index
      %12 = vector.load %arg8[%c0_10, %c0_11] : memref<512x32xf32, #tpu.memory_space<vmem>>, vector<512x32xf32>
      %c0_12 = arith.constant 0 : index
      %c0_13 = arith.constant 0 : index
      %13 = vector.load %arg5[%c0_12, %c0_13] : memref<1x32xf32, #tpu.memory_space<vmem>>, vector<1x32xf32>
      %c0_14 = arith.constant 0 : index
      %c0_15 = arith.constant 0 : index
      %14 = vector.load %arg6[%c0_14, %c0_15] : memref<1x32xf32, #tpu.memory_space<vmem>>, vector<1x32xf32>
      %15 = vector.broadcast %13 : vector<1x32xf32> to vector<512x32xf32>
      %16 = arith.mulf %12, %15 : vector<512x32xf32>
      %17 = vector.broadcast %14 : vector<1x32xf32> to vector<512x32xf32>
      %18 = arith.addf %16, %17 : vector<512x32xf32>
      %cst_16 = arith.constant 0.000000e+00 : f32
      %19 = vector.broadcast %cst_16 : f32 to vector<512x32xf32>
      %20 = arith.cmpf ogt, %18, %19 : vector<512x32xf32>
      %cst_17 = arith.constant 0.00999999977 : f32
      %21 = vector.broadcast %cst_17 : f32 to vector<512x32xf32>
      %22 = arith.mulf %21, %18 : vector<512x32xf32>
      %23 = arith.select %20, %18, %22 : vector<512x32xi1>, vector<512x32xf32>
      %24 = arith.truncf %23 : vector<512x32xf32> to vector<512x32xbf16>
      %c0_18 = arith.constant 0 : index
      %c0_19 = arith.constant 0 : index
      %25 = vector.load %arg7[%c0_18, %c0_19] : memref<512x32xbf16, #tpu.memory_space<vmem>>, vector<512x32xbf16>
      tpu.vector_store %arg7[%c0_18, %c0_19], %24 {strides = array<i32>} : memref<512x32xbf16, #tpu.memory_space<vmem>>, vector<512x32xbf16>,
    } else {
    }
    return
  }
  func.func @transform_0(%arg0: i32, %arg1: i32, %arg2: i32) -> (i32, i32) {
    %c0_i32 = arith.constant 0 : i32
    return %arg0, %arg2 : i32, i32
  }
  func.func @transform_1(%arg0: i32, %arg1: i32, %arg2: i32) -> (i32, i32) {
    %c0_i32 = arith.constant 0 : i32
    return %arg2, %arg1 : i32, i32
  }
  func.func @transform_2(%arg0: i32, %arg1: i32, %arg2: i32) -> (i32, i32) {
    %c0_i32 = arith.constant 0 : i32
    %c0_i32_0 = arith.constant 0 : i32
    return %c0_i32, %arg1 : i32, i32
  }
  func.func @transform_3(%arg0: i32, %arg1: i32, %arg2: i32) -> (i32, i32) {
    %c0_i32 = arith.constant 0 : i32
    %c0_i32_0 = arith.constant 0 : i32
    return %c0_i32, %arg1 : i32, i32
  }
  func.func @transform_4(%arg0: i32, %arg1: i32, %arg2: i32) -> (i32, i32) {
    %c0_i32 = arith.constant 0 : i32
    return %arg0, %arg1 : i32, i32
  }
}

</mosaic_0001>

<bundles_post_ra>
// kernel: tpu_custom_call.1
= control target key start
LH: loop header
LB: loop body
LE: loop exit
PB: predicated region body
PF: predicated region fallthrough
CT: control target
= control target key end

     0   :  { %s2469_s15 = smov 0   ;;  %s2471_s16 = smov 0   ;;  %s3214_s0 = inlined_call_operand.vmem [shape: bf16[8192,27], index: 0, kind: input, shape index: {}]   ;;  %s3215_s1 = inlined_call_operand.vmem [shape: bf16[27,32], index: 1, kind: input, shape index: {}]   ;;  %s3216_s2 = inlined_call_operand.vmem [shape: f32[1,32], index: 2, kind: input, shape index: {}]   ;;  %s3217_s3 = inlined_call_operand.vmem [shape: f32[1,32], index: 3, kind: input, shape index: {}]   ;;  %s3218_s4 = inlined_call_operand.vmem [shape: bf16[8192,32], index: 4, kind: output, shape index: {}]  }
   0x1   :  { %s2473_s17 = smov 0  }
   0x2 LB: > { %s33_s18 = sadd.s32 1, %s2436_s16  ;;  %p2047_p0 = scmp.ge.s32.totalorder %s2440_s17, 1  ;;  %s2440_s17 = sphi %s2473_s17, %s14_s17   ;;  %s2436_s16 = sphi %s2471_s16, %s3221_s16   ;;  %s2432_s15 = sphi %s2469_s15, %s3220_s15  }
   0x3   : > { %p35_p1 = scmp.ge.s32.totalorder %s33_s18, 16  ;;  %p221_p2 = scmp.lt.s32.totalorder %s2440_s17, 17 }
   0x5   : > { %s3223_s18 = smov (%p35_p1, %s33_s18), 0  ;;  %p222_p3 = pnand %p2047_p0, %p221_p2 }
   0x6   : > { %s2048_s21 = sshll.u32 (!%p222_p3), %s2432_s15, 6 }
   0x7   : > { %225 = sbr.rel (%p222_p3) target bundleno = 348 (0x15c), region = 36  ;;  %p2495_p4 = scmp.lt.s32.totalorder (!%p222_p3), %s2048_s21, 1023 }
   0xc   : > { %v2382_v0 = vld [vmem:[%s3215_s1 + $0x8] sm:$0x3f]   ;;  %vm770_vm0 = vcmask 1044480   ;;  %vm771_vm1 = vcmask 1045504   ;;  %v2442_v1 = vmov 65535   ;;  %vm305_vm2 = vcmask 261120  }
   0xd   : > { %v772_v2 = vsel %vm770_vm0, 4294967295, %v2442_v1  ;;  %v2504_v5 = vld [vmem:[%s3215_s1] sm:$0xff]   ;;  %v2443_v6 = vmov 0.0   ;;  %s3225_s21 = smov (!%p2495_p4, %s2048_s21), 1023  ;;  %vm673_vm3 = vcmask 220160   ;;  %vm1852_vm4 = vcmask 257024  }
   0xe   : > { %v773_v3 = vsel %vm771_vm1, %v772_v2, 0  ;;  %308 = vst.msk [vmem:[#allocation2 + $0x10] sm:$0xff] %vm305_vm2, %v2443_v6  ;;  %306 = vst.msk [vmem:[#allocation2] sm:$0xff] %vm305_vm2, %v2443_v6  ;;  %s2049_s25 = sshll.u32 %s3225_s21, 2  ;;  %v2729_v1 = vld [vmem:[%s3216_s2] ss:$0 sm:$0xff] }
   0xf   : > { %v2499_v4 = vand.u32 %v2382_v0, %v773_v3  ;;  %307 = vst.msk [vmem:[#allocation2 + $0x8] sm:$0xff] %vm305_vm2, %v2443_v6  ;;  %309 = vst.msk [vmem:[#allocation2 + $0x18] sm:$0xff] %vm305_vm2, %v2443_v6  ;;  %s2652_s28 = scalar_lea.vmem %s3214_s0, %s2049_s25  ;;  %s2767_s9 = scalar_lea.vmem %s3218_s4, %s2049_s25 }
  0x10   : > { %310 = vst.msk [vmem:[#allocation2 + $0x20] sm:$0xff] %vm305_vm2, %v2443_v6  ;;  %311 = vst.msk [vmem:[#allocation2 + $0x28] sm:$0xff] %vm305_vm2, %v2443_v6  ;;  %v2384_v7 = vld [vmem:[%s2652_s28] sm:$0xff]   ;;  %v2386_v9 = vld [vmem:[%s2652_s28 + $0x8] sm:$0xff]  }
  0x11   : > { %312 = vst.msk [vmem:[#allocation2 + $0x30] sm:$0xff] %vm305_vm2, %v2443_v6  ;;  %313 = vst.msk [vmem:[#allocation2 + $0x38] sm:$0xff] %vm305_vm2, %v2443_v6  ;;  %2284 = vmatprep.subr.bf16.mxu0 %v2499_v4  ;;  %2352 = vmatprep.subr.bf16.mxu1 %v2499_v4  ;;  %v2385_v8 = vld [vmem:[%s2652_s28 + $0x80] sm:$0xff]   ;;  %v2387_v10 = vld [vmem:[%s2652_s28 + $0x88] sm:$0xff]  }
  0x12   : > { %314 = vst.msk [vmem:[#allocation2 + $0x40] sm:$0xff] %vm305_vm2, %v2443_v6  ;;  %315 = vst.msk [vmem:[#allocation2 + $0x48] sm:$0xff] %vm305_vm2, %v2443_v6  ;;  %2285 = vmatpush3.bf16.msra.mxu0 %v2499_v4  ;;  %2354 = vmatpush3.bf16.msra.mxu1 %v2499_v4  ;;  %v2388_v11 = vld [vmem:[%s2652_s28 + $0x10] sm:$0xff]   ;;  %v2390_v13 = vld [vmem:[%s2652_s28 + $0x18] sm:$0xff]  }
  0x13   : > { %316 = vst.msk [vmem:[#allocation2 + $0x50] sm:$0xff] %vm305_vm2, %v2443_v6  ;;  %317 = vst.msk [vmem:[#allocation2 + $0x58] sm:$0xff] %vm305_vm2, %v2443_v6  ;;  %2286 = vmatprep.subr.bf16.mxu0 %v2504_v5  ;;  %2353 = vmatprep.subr.bf16.mxu1 %v2504_v5  ;;  %v2389_v12 = vld [vmem:[%s2652_s28 + $0x90] sm:$0xff]   ;;  %v2391_v14 = vld [vmem:[%s2652_s28 + $0x98] sm:$0xff]  }
  0x14   : > { %318 = vst.msk [vmem:[#allocation2 + $0x60] sm:$0xff] %vm305_vm2, %v2443_v6  ;;  %319 = vst.msk [vmem:[#allocation2 + $0x68] sm:$0xff] %vm305_vm2, %v2443_v6  ;;  %2288 = vmatprep.mubr.msk.bf16.mxu0 %vm673_vm3, %v2384_v7  ;;  %2320 = vmatprep.mubr.msk.bf16.mxu1 %vm673_vm3, %v2385_v8  ;;  %v2392_v15 = vld [vmem:[%s2652_s28 + $0x20] sm:$0xff]   ;;  %v2394_v17 = vld [vmem:[%s2652_s28 + $0x28] sm:$0xff]  }
  0x15   : > { %320 = vst.msk [vmem:[#allocation2 + $0x70] sm:$0xff] %vm305_vm2, %v2443_v6  ;;  %321 = vst.msk [vmem:[#allocation2 + $0x78] sm:$0xff] %vm305_vm2, %v2443_v6  ;;  %v2393_v16 = vld [vmem:[%s2652_s28 + $0xa0] sm:$0xff]   ;;  %v2395_v18 = vld [vmem:[%s2652_s28 + $0xa8] sm:$0xff]  }
  0x16   : > { %322 = vst.msk [vmem:[#allocation2 + $0x80] sm:$0xff] %vm305_vm2, %v2443_v6  ;;  %323 = vst.msk [vmem:[#allocation2 + $0x88] sm:$0xff] %vm305_vm2, %v2443_v6  ;;  %2287 = vmatpush3.bf16.msra.mxu0 %v2504_v5  ;;  %2355 = vmatpush3.bf16.msra.mxu1 %v2504_v5  ;;  %v2396_v19 = vld [vmem:[%s2652_s28 + $0x30] sm:$0xff]   ;;  %v2398_v21 = vld [vmem:[%s2652_s28 + $0x38] sm:$0xff]  }
  0x17   : > { %324 = vst.msk [vmem:[#allocation2 + $0x90] sm:$0xff] %vm305_vm2, %v2443_v6  ;;  %325 = vst.msk [vmem:[#allocation2 + $0x98] sm:$0xff] %vm305_vm2, %v2443_v6  ;;  %v2397_v20 = vld [vmem:[%s2652_s28 + $0xb0] sm:$0xff]   ;;  %v2399_v22 = vld [vmem:[%s2652_s28 + $0xb8] sm:$0xff]  }
  0x18   : > { %326 = vst.msk [vmem:[#allocation2 + $0xa0] sm:$0xff] %vm305_vm2, %v2443_v6  ;;  %327 = vst.msk [vmem:[#allocation2 + $0xa8] sm:$0xff] %vm305_vm2, %v2443_v6  ;;  %v2400_v23 = vld [vmem:[%s2652_s28 + $0x40] sm:$0xff]   ;;  %v2402_v25 = vld [vmem:[%s2652_s28 + $0x48] sm:$0xff]  }
  0x19   : > { %328 = vst.msk [vmem:[#allocation2 + $0xb0] sm:$0xff] %vm305_vm2, %v2443_v6  ;;  %329 = vst.msk [vmem:[#allocation2 + $0xb8] sm:$0xff] %vm305_vm2, %v2443_v6  ;;  %2289 = vmatmul.mubr.msk.bf16.vlgmr.msra.gmra.mxu0 %vm673_vm3, %v2386_v9  ;;  %2321 = vmatmul.mubr.msk.bf16.vlgmr.msra.gmra.mxu1 %vm673_vm3, %v2387_v10  ;;  %v2401_v24 = vld [vmem:[%s2652_s28 + $0xc0] sm:$0xff]   ;;  %v2403_v26 = vld [vmem:[%s2652_s28 + $0xc8] sm:$0xff]  }
  0x1a   : > { %330 = vst.msk [vmem:[#allocation2 + $0xc0] sm:$0xff] %vm305_vm2, %v2443_v6  ;;  %331 = vst.msk [vmem:[#allocation2 + $0xc8] sm:$0xff] %vm305_vm2, %v2443_v6  ;;  %2292 = vmatprep.mubr.msk.bf16.mxu0 %vm673_vm3, %v2388_v11  ;;  %2324 = vmatprep.mubr.msk.bf16.mxu1 %vm673_vm3, %v2389_v12  ;;  %v2404_v27 = vld [vmem:[%s2652_s28 + $0x50] sm:$0xff]   ;;  %v2406_v29 = vld [vmem:[%s2652_s28 + $0x58] sm:$0xff]  }
  0x1b   : > { %332 = vst.msk [vmem:[#allocation2 + $0xd0] sm:$0xff] %vm305_vm2, %v2443_v6  ;;  %333 = vst.msk [vmem:[#allocation2 + $0xd8] sm:$0xff] %vm305_vm2, %v2443_v6  ;;  %v2405_v28 = vld [vmem:[%s2652_s28 + $0xd0] sm:$0xff]   ;;  %v2407_v30 = vld [vmem:[%s2652_s28 + $0xd8] sm:$0xff]  }
  0x1c   : > { %334 = vst.msk [vmem:[#allocation2 + $0xe0] sm:$0xff] %vm305_vm2, %v2443_v6  ;;  %335 = vst.msk [vmem:[#allocation2 + $0xe8] sm:$0xff] %vm305_vm2, %v2443_v6  ;;  %v2408_v31 = vld [vmem:[%s2652_s28 + $0x60] sm:$0xff]   ;;  %v2410_v33 = vld [vmem:[%s2652_s28 + $0x68] sm:$0xff]  }
  0x1d   : > { %336 = vst.msk [vmem:[#allocation2 + $0xf0] sm:$0xff] %vm305_vm2, %v2443_v6  ;;  %337 = vst.msk [vmem:[#allocation2 + $0xf8] sm:$0xff] %vm305_vm2, %v2443_v6  ;;  %v2409_v32 = vld [vmem:[%s2652_s28 + $0xe0] sm:$0xff]   ;;  %v2411_v34 = vld [vmem:[%s2652_s28 + $0xe8] sm:$0xff]  }
  0x1e   : > { %338 = vst.msk [vmem:[#allocation2 + $0x100] sm:$0xff] %vm305_vm2, %v2443_v6  ;;  %339 = vst.msk [vmem:[#allocation2 + $0x108] sm:$0xff] %vm305_vm2, %v2443_v6  ;;  %v2412_v35 = vld [vmem:[%s2652_s28 + $0x70] sm:$0xff]   ;;  %v2414_v37 = vld [vmem:[%s2652_s28 + $0x78] sm:$0xff]  }
  0x1f   : > { %340 = vst.msk [vmem:[#allocation2 + $0x110] sm:$0xff] %vm305_vm2, %v2443_v6  ;;  %341 = vst.msk [vmem:[#allocation2 + $0x118] sm:$0xff] %vm305_vm2, %v2443_v6  ;;  %v2413_v36 = vld [vmem:[%s2652_s28 + $0xf0] sm:$0xff]   ;;  %v2415_v38 = vld [vmem:[%s2652_s28 + $0xf8] sm:$0xff]  }
  0x20   : > { %342 = vst.msk [vmem:[#allocation2 + $0x120] sm:$0xff] %vm305_vm2, %v2443_v6  ;;  %343 = vst.msk [vmem:[#allocation2 + $0x128] sm:$0xff] %vm305_vm2, %v2443_v6  ;;  %v372_v39 = vld [vmem:[#allocation2 + $0x10] sm:$0xff]  ;;  %v370_v43 = vld [vmem:[#allocation2] sm:$0xff] }
  0x21   : > { %344 = vst.msk [vmem:[#allocation2 + $0x130] sm:$0xff] %vm305_vm2, %v2443_v6  ;;  %345 = vst.msk [vmem:[#allocation2 + $0x138] sm:$0xff] %vm305_vm2, %v2443_v6  ;;  %2293 = vmatmul.mubr.msk.bf16.gmra.mxu0 %vm673_vm3, %v2390_v13  ;;  %2325 = vmatmul.mubr.msk.bf16.gmra.mxu1 %vm673_vm3, %v2391_v14  ;;  %v373_v49 = vld [vmem:[#allocation2 + $0x18] sm:$0xff]  ;;  %v371_v55 = vld [vmem:[#allocation2 + $0x8] sm:$0xff] }
  0x22   : > { %346 = vst.msk [vmem:[#allocation2 + $0x140] sm:$0xff] %vm305_vm2, %v2443_v6  ;;  %347 = vst.msk [vmem:[#allocation2 + $0x148] sm:$0xff] %vm305_vm2, %v2443_v6  ;;  %2296 = vmatprep.mubr.msk.bf16.mxu0 %vm673_vm3, %v2392_v15  ;;  %2328 = vmatprep.mubr.msk.bf16.mxu1 %vm673_vm3, %v2393_v16  ;;  %v376_v61 = vld [vmem:[#allocation2 + $0x30] sm:$0xff]  ;;  %v374_v4 = vld [vmem:[#allocation2 + $0x20] sm:$0xff] }
  0x23   : > { %348 = vst.msk [vmem:[#allocation2 + $0x150] sm:$0xff] %vm305_vm2, %v2443_v6  ;;  %349 = vst.msk [vmem:[#allocation2 + $0x158] sm:$0xff] %vm305_vm2, %v2443_v6  ;;  %v2736_v9 = vld [vmem:[%s3217_s3] ss:$0 sm:$0xff] }
  0x24   : > { %350 = vst.msk [vmem:[#allocation2 + $0x160] sm:$0xff] %vm305_vm2, %v2443_v6  ;;  %351 = vst.msk [vmem:[#allocation2 + $0x168] sm:$0xff] %vm305_vm2, %v2443_v6 }
  0x25   : > { %352 = vst.msk [vmem:[#allocation2 + $0x170] sm:$0xff] %vm305_vm2, %v2443_v6  ;;  %353 = vst.msk [vmem:[#allocation2 + $0x178] sm:$0xff] %vm305_vm2, %v2443_v6  ;;  %v402_v44 = vld [vmem:[#allocation2 + $0x100] sm:$0xff]  ;;  %v403_v56 = vld [vmem:[#allocation2 + $0x108] sm:$0xff] }
  0x26   : > { %354 = vst.msk [vmem:[#allocation2 + $0x180] sm:$0xff] %vm305_vm2, %v2443_v6  ;;  %355 = vst.msk [vmem:[#allocation2 + $0x188] sm:$0xff] %vm305_vm2, %v2443_v6  ;;  %v404_v40 = vld [vmem:[#allocation2 + $0x110] sm:$0xff]  ;;  %v405_v50 = vld [vmem:[#allocation2 + $0x118] sm:$0xff] }
  0x27   : > { %356 = vst.msk [vmem:[#allocation2 + $0x190] sm:$0xff] %vm305_vm2, %v2443_v6  ;;  %357 = vst.msk [vmem:[#allocation2 + $0x198] sm:$0xff] %vm305_vm2, %v2443_v6  ;;  %v406_v5 = vld [vmem:[#allocation2 + $0x120] sm:$0xff] }
  0x28   : > { %358 = vst.msk [vmem:[#allocation2 + $0x1a0] sm:$0xff] %vm305_vm2, %v2443_v6  ;;  %359 = vst.msk [vmem:[#allocation2 + $0x1a8] sm:$0xff] %vm305_vm2, %v2443_v6  ;;  %v408_v62 = vld [vmem:[#allocation2 + $0x130] sm:$0xff] }
  0x29   : > { %360 = vst.msk [vmem:[#allocation2 + $0x1b0] sm:$0xff] %vm305_vm2, %v2443_v6  ;;  %361 = vst.msk [vmem:[#allocation2 + $0x1b8] sm:$0xff] %vm305_vm2, %v2443_v6  ;;  %2297 = vmatmul.mubr.msk.bf16.gmra.mxu0 %vm673_vm3, %v2394_v17  ;;  %2329 = vmatmul.mubr.msk.bf16.gmra.mxu1 %vm673_vm3, %v2395_v18  ;;  %v377_v17 = vld [vmem:[#allocation2 + $0x38] sm:$0xff] }
  0x2a   : > { %362 = vst.msk [vmem:[#allocation2 + $0x1c0] sm:$0xff] %vm305_vm2, %v2443_v6  ;;  %363 = vst.msk [vmem:[#allocation2 + $0x1c8] sm:$0xff] %vm305_vm2, %v2443_v6  ;;  %2300 = vmatprep.mubr.msk.bf16.mxu0 %vm673_vm3, %v2396_v19  ;;  %2332 = vmatprep.mubr.msk.bf16.mxu1 %vm673_vm3, %v2397_v20  ;;  %v409_v18 = vld [vmem:[#allocation2 + $0x138] sm:$0xff] }
  0x2b   : > { %364 = vst.msk [vmem:[#allocation2 + $0x1d0] sm:$0xff] %vm305_vm2, %v2443_v6  ;;  %365 = vst.msk [vmem:[#allocation2 + $0x1d8] sm:$0xff] %vm305_vm2, %v2443_v6 }
  0x2c   : > { %366 = vst.msk [vmem:[#allocation2 + $0x1e0] sm:$0xff] %vm305_vm2, %v2443_v6  ;;  %367 = vst.msk [vmem:[#allocation2 + $0x1e8] sm:$0xff] %vm305_vm2, %v2443_v6 }
  0x2d   : > { %368 = vst.msk [vmem:[#allocation2 + $0x1f0] sm:$0xff] %vm305_vm2, %v2443_v6  ;;  %369 = vst.msk [vmem:[#allocation2 + $0x1f8] sm:$0xff] %vm305_vm2, %v2443_v6 }
  0x31   : > { %2301 = vmatmul.mubr.msk.bf16.gmra.mxu0 %vm673_vm3, %v2398_v21  ;;  %2333 = vmatmul.mubr.msk.bf16.gmra.mxu1 %vm673_vm3, %v2399_v22 }
  0x32   : > { %2304 = vmatprep.mubr.msk.bf16.mxu0 %vm673_vm3, %v2400_v23  ;;  %2336 = vmatprep.mubr.msk.bf16.mxu1 %vm673_vm3, %v2401_v24 }
  0x39   : > { %2305 = vmatmul.mubr.msk.bf16.gmra.mxu0 %vm673_vm3, %v2402_v25  ;;  %2337 = vmatmul.mubr.msk.bf16.gmra.mxu1 %vm673_vm3, %v2403_v26 }
  0x3a   : > { %2308 = vmatprep.mubr.msk.bf16.mxu0 %vm673_vm3, %v2404_v27  ;;  %2340 = vmatprep.mubr.msk.bf16.mxu1 %vm673_vm3, %v2405_v28 }
  0x41   : > { %2309 = vmatmul.mubr.msk.bf16.gmra.mxu0 %vm673_vm3, %v2406_v29  ;;  %2341 = vmatmul.mubr.msk.bf16.gmra.mxu1 %vm673_vm3, %v2407_v30 }
  0x42   : > { %2312 = vmatprep.mubr.msk.bf16.mxu0 %vm673_vm3, %v2408_v31  ;;  %2344 = vmatprep.mubr.msk.bf16.mxu1 %vm673_vm3, %v2409_v32 }
  0x49   : > { %2313 = vmatmul.mubr.msk.bf16.gmra.mxu0 %vm673_vm3, %v2410_v33  ;;  %2345 = vmatmul.mubr.msk.bf16.gmra.mxu1 %vm673_vm3, %v2411_v34 }
  0x4a   : > { %2316 = vmatprep.mubr.msk.bf16.mxu0 %vm673_vm3, %v2412_v35  ;;  %2348 = vmatprep.mubr.msk.bf16.mxu1 %vm673_vm3, %v2413_v36 }
  0x51   : > { %2317 = vmatmul.mubr.msk.bf16.gmra.mxu0 %vm673_vm3, %v2414_v37  ;;  %2349 = vmatmul.mubr.msk.bf16.gmra.mxu1 %vm673_vm3, %v2415_v38 }
  0xd9   : > { %v2290_v41 = vpop.f32.mrf.mxu0  ;;  %v2322_v42 = vpop.f32.mrf.mxu1 }
  0xda   : > { %v1068_v45 = vadd.f32 %v2290_v41, %v372_v39  ;;  %v1100_v46 = vadd.f32 %v2322_v42, %v404_v40 }
  0xdb   : > { %v811_v47 = vpop.f32.mrf.mxu0  ;;  %v939_v48 = vpop.f32.mrf.mxu1 }
  0xdc   : > { %1133 = vst.msk [vmem:[#allocation2 + $0x10] sm:$0xff] %vm305_vm2, %v1068_v45  ;;  %1165 = vst.msk [vmem:[#allocation2 + $0x110] sm:$0xff] %vm305_vm2, %v1100_v46  ;;  %v1066_v51 = vadd.f32 %v811_v47, %v370_v43  ;;  %v1098_v52 = vadd.f32 %v939_v48, %v402_v44 }
  0xdd   : > { %v2291_v53 = vpop.f32.mrf.mxu0  ;;  %v2323_v54 = vpop.f32.mrf.mxu1 }
  0xde   : > { %1131 = vst.msk [vmem:[#allocation2] sm:$0xff] %vm305_vm2, %v1066_v51  ;;  %1163 = vst.msk [vmem:[#allocation2 + $0x100] sm:$0xff] %vm305_vm2, %v1098_v52  ;;  %v1069_v57 = vadd.f32 %v2291_v53, %v373_v49  ;;  %v1101_v58 = vadd.f32 %v2323_v54, %v405_v50 }
  0xdf   : > { %v814_v59 = vpop.f32.mrf.mxu0  ;;  %v942_v60 = vpop.f32.mrf.mxu1 }
  0xe0   : > { %1134 = vst.msk [vmem:[#allocation2 + $0x18] sm:$0xff] %vm305_vm2, %v1069_v57  ;;  %1166 = vst.msk [vmem:[#allocation2 + $0x118] sm:$0xff] %vm305_vm2, %v1101_v58  ;;  %v1067_v63 = vadd.f32 %v814_v59, %v371_v55  ;;  %v1099_v0 = vadd.f32 %v942_v60, %v403_v56 }
  0xe1   : > { %v2294_v2 = vpop.f32.mrf.mxu0  ;;  %v2326_v3 = vpop.f32.mrf.mxu1 }
  0xe2   : > { %1132 = vst.msk [vmem:[#allocation2 + $0x8] sm:$0xff] %vm305_vm2, %v1067_v63  ;;  %1164 = vst.msk [vmem:[#allocation2 + $0x108] sm:$0xff] %vm305_vm2, %v1099_v0  ;;  %v1072_v6 = vadd.f32 %v2294_v2, %v376_v61  ;;  %v1104_v7 = vadd.f32 %v2326_v3, %v408_v62 }
  0xe3   : > { %v1200_v8 = vld [vmem:[#allocation2 + $0x10] sm:$0xff]  ;;  %v827_v11 = vpop.f32.mrf.mxu0  ;;  %v955_v12 = vpop.f32.mrf.mxu1 }
  0xe4   : > { %v1232_v10 = vld [vmem:[#allocation2 + $0x110] sm:$0xff]  ;;  %v1272_v13 = vmul.f32 %v2729_v1, %v1200_v8  ;;  %1137 = vst.msk [vmem:[#allocation2 + $0x30] sm:$0xff] %vm305_vm2, %v1072_v6  ;;  %1169 = vst.msk [vmem:[#allocation2 + $0x130] sm:$0xff] %vm305_vm2, %v1104_v7  ;;  %v1070_v15 = vadd.f32 %v827_v11, %v374_v4  ;;  %v1102_v16 = vadd.f32 %v955_v12, %v406_v5 }
  0xe5   : > { %v1304_v14 = vmul.f32 %v2729_v1, %v1232_v10  ;;  %v1198_v19 = vld [vmem:[#allocation2] sm:$0xff]  ;;  %v2295_v21 = vpop.f32.mrf.mxu0  ;;  %v2327_v22 = vpop.f32.mrf.mxu1 }
  0xe6   : > { %v1230_v20 = vld [vmem:[#allocation2 + $0x100] sm:$0xff]  ;;  %v1342_v23 = vadd.f32 %v2736_v9, %v1272_v13  ;;  %v1270_v25 = vmul.f32 %v2729_v1, %v1198_v19  ;;  %1135 = vst.msk [vmem:[#allocation2 + $0x20] sm:$0xff] %vm305_vm2, %v1070_v15  ;;  %1167 = vst.msk [vmem:[#allocation2 + $0x120] sm:$0xff] %vm305_vm2, %v1102_v16  ;;  %v1073_v29 = vadd.f32 %v2295_v21, %v377_v17 }
  0xe7   : > { %v1374_v24 = vadd.f32 %v2736_v9, %v1304_v14  ;;  %v1302_v26 = vmul.f32 %v2729_v1, %v1230_v20  ;;  %v1201_v27 = vld [vmem:[#allocation2 + $0x18] sm:$0xff]  ;;  %v1105_v30 = vadd.f32 %v2327_v22, %v409_v18  ;;  %v2748_v31 = vpop.f32.mrf.mxu0  ;;  %v2750_v32 = vpop.f32.mrf.mxu1 }
  0xe8   : > { %v1233_v28 = vld [vmem:[#allocation2 + $0x118] sm:$0xff]  ;;  %vm1406_vm5 = vcmp.gt.f32.partialorder %v1342_v23, 0.0  ;;  %v1470_v33 = vmul.f32 0.01, %v1342_v23  ;;  %v1340_v35 = vadd.f32 %v2736_v9, %v1270_v25  ;;  %v1273_v37 = vmul.f32 %v2729_v1, %v1201_v27  ;;  %1138 = vst.msk [vmem:[#allocation2 + $0x38] sm:$0xff] %vm305_vm2, %v1073_v29  ;;  %v375_v25 = vld [vmem:[#allocation2 + $0x28] sm:$0xff] }
  0xe9   : > { %vm1438_vm6 = vcmp.gt.f32.partialorder %v1374_v24, 0.0  ;;  %v1502_v34 = vmul.f32 0.01, %v1374_v24  ;;  %v1372_v36 = vadd.f32 %v2736_v9, %v1302_v26  ;;  %v1305_v38 = vmul.f32 %v2729_v1, %v1233_v28  ;;  %v1199_v39 = vld [vmem:[#allocation2 + $0x8] sm:$0xff]  ;;  %1170 = vst.msk [vmem:[#allocation2 + $0x138] sm:$0xff] %vm305_vm2, %v1105_v30  ;;  %v2758_v41 = vpop.f32.mrf.mxu0  ;;  %v2760_v42 = vpop.f32.mrf.mxu1 }
  0xea   : > { %v1231_v40 = vld [vmem:[#allocation2 + $0x108] sm:$0xff]  ;;  %v1534_v43 = vsel %vm1406_vm5, %v1342_v23, %v1470_v33  ;;  %v1271_v45 = vmul.f32 %v2729_v1, %v1199_v39  ;;  %vm1404_vm7 = vcmp.gt.f32.partialorder %v1340_v35, 0.0  ;;  %v1468_v49 = vmul.f32 0.01, %v1340_v35 }
  0xeb   : > { %v1566_v44 = vsel %vm1438_vm6, %v1374_v24, %v1502_v34  ;;  %v1303_v46 = vmul.f32 %v2729_v1, %v1231_v40  ;;  %v2188_v47 = vpack.c.bf16 %v1534_v43, %v1534_v43  ;;  %v1204_v50 = vld [vmem:[#allocation2 + $0x30] sm:$0xff]  ;;  %v2771_v51 = vpop.f32.mrf.mxu0  ;;  %v2773_v52 = vpop.f32.mrf.mxu1  ;;  %vm1436_vm8 = vcmp.gt.f32.partialorder %v1372_v36, 0.0  ;;  %v407_v26 = vld [vmem:[#allocation2 + $0x128] sm:$0xff] }
  0xec   : > { %v2220_v48 = vpack.c.bf16 %v1566_v44, %v1566_v44  ;;  %v1500_v53 = vmul.f32 0.01, %v1372_v36  ;;  %v1343_v54 = vadd.f32 %v2736_v9, %v1273_v37  ;;  %v1375_v55 = vadd.f32 %v2736_v9, %v1305_v38  ;;  %v1236_v2 = vld [vmem:[#allocation2 + $0x130] sm:$0xff] }
  0xed   : > { %1855 = vst.msk [vmem:[%s2767_s9 + $0x8] sm:$0xf] %vm1852_vm4, %v2188_v47  ;;  %v1532_v56 = vsel %vm1404_vm7, %v1340_v35, %v1468_v49  ;;  %v1341_v57 = vadd.f32 %v2736_v9, %v1271_v45  ;;  %v1373_v58 = vadd.f32 %v2736_v9, %v1303_v46  ;;  %v1276_v59 = vmul.f32 %v2729_v1, %v1204_v50  ;;  %v2784_v60 = vpop.f32.mrf.mxu0  ;;  %v2786_v61 = vpop.f32.mrf.mxu1  ;;  %v1202_v5 = vld [vmem:[#allocation2 + $0x20] sm:$0xff]  ;;  %v380_v44 = vld [vmem:[#allocation2 + $0x50] sm:$0xff] }
  0xee   : > { %1887 = vst.msk [vmem:[%s2767_s9 + $0x88] sm:$0xf] %vm1852_vm4, %v2220_v48  ;;  %v2186_v62 = vpack.c.bf16 %v1532_v56, %v1532_v56  ;;  %v1564_v63 = vsel %vm1436_vm8, %v1372_v36, %v1500_v53  ;;  %vm1407_vm9 = vcmp.gt.f32.partialorder %v1343_v54, 0.0  ;;  %v1471_v0 = vmul.f32 0.01, %v1343_v54  ;;  %v1234_v16 = vld [vmem:[#allocation2 + $0x120] sm:$0xff] }
  0xef   : > { %v2218_v3 = vpack.c.bf16 %v1564_v63, %v1564_v63  ;;  %vm1439_vm10 = vcmp.gt.f32.partialorder %v1375_v55, 0.0  ;;  %v1503_v4 = vmul.f32 0.01, %v1375_v55  ;;  %vm1405_vm11 = vcmp.gt.f32.partialorder %v1341_v57, 0.0  ;;  %v2788_v6 = vpop.f32.mrf.mxu0  ;;  %v2790_v7 = vpop.f32.mrf.mxu1  ;;  %v1205_v17 = vld [vmem:[#allocation2 + $0x38] sm:$0xff]  ;;  %v412_v45 = vld [vmem:[#allocation2 + $0x150] sm:$0xff] }
  0xf0   : > { %1853 = vst.msk [vmem:[%s2767_s9] sm:$0xf] %vm1852_vm4, %v2186_v62  ;;  %v1535_v8 = vsel %vm1407_vm9, %v1343_v54, %v1471_v0  ;;  %v1469_v10 = vmul.f32 0.01, %v1341_v57  ;;  %vm1437_vm12 = vcmp.gt.f32.partialorder %v1373_v58, 0.0  ;;  %v1346_v14 = vadd.f32 %v2736_v9, %v1276_v59  ;;  %v1237_v24 = vld [vmem:[#allocation2 + $0x138] sm:$0xff] }
  0xf1   : > { %v1501_v11 = vmul.f32 0.01, %v1373_v58  ;;  %1885 = vst.msk [vmem:[%s2767_s9 + $0x80] sm:$0xf] %vm1852_vm4, %v2218_v3  ;;  %v2189_v12 = vpack.c.bf16 %v1535_v8, %v1535_v8  ;;  %v1567_v13 = vsel %vm1439_vm10, %v1375_v55, %v1503_v4  ;;  %v1308_v15 = vmul.f32 %v2729_v1, %v1236_v2  ;;  %v2798_v18 = vpop.f32.mrf.mxu0  ;;  %v2800_v19 = vpop.f32.mrf.mxu1  ;;  %v378_v46 = vld [vmem:[#allocation2 + $0x40] sm:$0xff]  ;;  %v381_v0 = vld [vmem:[#allocation2 + $0x58] sm:$0xff] }
  0xf2   : > { %v2221_v20 = vpack.c.bf16 %v1567_v13, %v1567_v13  ;;  %v1533_v21 = vsel %vm1405_vm11, %v1341_v57, %v1469_v10  ;;  %v1274_v23 = vmul.f32 %v2729_v1, %v1202_v5  ;;  %vm1410_vm13 = vcmp.gt.f32.partialorder %v1346_v14, 0.0  ;;  %v410_v63 = vld [vmem:[#allocation2 + $0x140] sm:$0xff]  ;;  %v413_v5 = vld [vmem:[#allocation2 + $0x158] sm:$0xff]  ;;  %v379_v8 = vld [vmem:[#allocation2 + $0x48] sm:$0xff] }
  0xf3   : > { %v1565_v22 = vsel %vm1437_vm12, %v1373_v58, %v1501_v11  ;;  %1856 = vst.msk [vmem:[%s2767_s9 + $0xc] sm:$0xf] %vm1852_vm4, %v2189_v12  ;;  %v2187_v27 = vpack.c.bf16 %v1533_v21, %v1533_v21  ;;  %v1474_v29 = vmul.f32 0.01, %v1346_v14  ;;  %v2806_v30 = vpop.f32.mrf.mxu0  ;;  %v2808_v33 = vpop.f32.mrf.mxu1  ;;  %v1378_v34 = vadd.f32 %v2736_v9, %v1308_v15  ;;  %v411_v10 = vld [vmem:[#allocation2 + $0x148] sm:$0xff]  ;;  %v416_v13 = vld [vmem:[#allocation2 + $0x170] sm:$0xff] }
  0xf4   : > { %v2219_v28 = vpack.c.bf16 %v1565_v22, %v1565_v22  ;;  %1888 = vst.msk [vmem:[%s2767_s9 + $0x8c] sm:$0xf] %vm1852_vm4, %v2221_v20  ;;  %v1344_v35 = vadd.f32 %v2736_v9, %v1274_v23  ;;  %v1306_v36 = vmul.f32 %v2729_v1, %v1234_v16  ;;  %v1277_v37 = vmul.f32 %v2729_v1, %v1205_v17  ;;  %v382_v20 = vld [vmem:[#allocation2 + $0x60] sm:$0xff]  ;;  %v385_v22 = vld [vmem:[#allocation2 + $0x78] sm:$0xff] }
  0xf5   : > { %1854 = vst.msk [vmem:[%s2767_s9 + $0x4] sm:$0xf] %vm1852_vm4, %v2187_v27  ;;  %v1538_v38 = vsel %vm1410_vm13, %v1346_v14, %v1474_v29  ;;  %v1309_v39 = vmul.f32 %v2729_v1, %v1237_v24  ;;  %v1071_v40 = vadd.f32 %v2748_v31, %v375_v25  ;;  %v1103_v43 = vadd.f32 %v2750_v32, %v407_v26  ;;  %v2823_v47 = vpop.f32.mrf.mxu0  ;;  %v2825_v48 = vpop.f32.mrf.mxu1  ;;  %v414_v21 = vld [vmem:[#allocation2 + $0x160] sm:$0xff]  ;;  %v417_v29 = vld [vmem:[#allocation2 + $0x178] sm:$0xff] }
  0xf6   : > { %1886 = vst.msk [vmem:[%s2767_s9 + $0x84] sm:$0xf] %vm1852_vm4, %v2219_v28  ;;  %v2192_v49 = vpack.c.bf16 %v1538_v38, %v1538_v38  ;;  %vm1442_vm14 = vcmp.gt.f32.partialorder %v1378_v34, 0.0  ;;  %v1506_v50 = vmul.f32 0.01, %v1378_v34  ;;  %vm1408_vm15 = vcmp.gt.f32.partialorder %v1344_v35, 0.0 }
  0xf7   : > { %v1472_v53 = vmul.f32 0.01, %v1344_v35  ;;  %v1376_v54 = vadd.f32 %v2736_v9, %v1306_v36  ;;  %v1347_v55 = vadd.f32 %v2736_v9, %v1277_v37  ;;  %v1379_v31 = vadd.f32 %v2736_v9, %v1309_v39  ;;  %1136 = vst.msk [vmem:[#allocation2 + $0x28] sm:$0xff] %vm305_vm2, %v1071_v40  ;;  %1168 = vst.msk [vmem:[#allocation2 + $0x128] sm:$0xff] %vm305_vm2, %v1103_v43  ;;  %v2832_v32 = vpop.f32.mrf.mxu0  ;;  %v2834_v56 = vpop.f32.mrf.mxu1  ;;  %v388_v38 = vld [vmem:[#allocation2 + $0x90] sm:$0xff]  ;;  %v386_v39 = vld [vmem:[#allocation2 + $0x80] sm:$0xff] }
  0xf8   : > { %1859 = vst.msk [vmem:[%s2767_s9 + $0x18] sm:$0xf] %vm1852_vm4, %v2192_v49  ;;  %v1570_v57 = vsel %vm1442_vm14, %v1378_v34, %v1506_v50  ;;  %v1076_v58 = vadd.f32 %v2758_v41, %v380_v44  ;;  %v1108_v59 = vadd.f32 %v2760_v42, %v412_v45  ;;  %v1074_v62 = vadd.f32 %v2771_v51, %v378_v46  ;;  %v384_v51 = vld [vmem:[#allocation2 + $0x70] sm:$0xff]  ;;  %v383_v34 = vld [vmem:[#allocation2 + $0x68] sm:$0xff]  ;;  %v418_v49 = vld [vmem:[#allocation2 + $0x180] sm:$0xff] }
  0xf9   : > { %v2224_v2 = vpack.c.bf16 %v1570_v57, %v1570_v57  ;;  %v1536_v3 = vsel %vm1408_vm15, %v1344_v35, %v1472_v53  ;;  %vm1440_vm0 = vcmp.gt.f32.partialorder %v1376_v54, 0.0  ;;  %v1504_v4 = vmul.f32 0.01, %v1376_v54  ;;  %v2842_v11 = vpop.f32.mrf.mxu0  ;;  %v2844_v12 = vpop.f32.mrf.mxu1 }
  0xfa   : > { %v2190_v41 = vpack.c.bf16 %v1536_v3, %v1536_v3  ;;  %vm1411_vm1 = vcmp.gt.f32.partialorder %v1347_v55, 0.0  ;;  %v1475_v42 = vmul.f32 0.01, %v1347_v55  ;;  %vm1443_vm3 = vcmp.gt.f32.partialorder %v1379_v31, 0.0  ;;  %1141 = vst.msk [vmem:[#allocation2 + $0x50] sm:$0xff] %vm305_vm2, %v1076_v58  ;;  %1173 = vst.msk [vmem:[#allocation2 + $0x150] sm:$0xff] %vm305_vm2, %v1108_v59 }
  0xfb   : > { %1139 = vst.msk [vmem:[#allocation2 + $0x40] sm:$0xff] %vm305_vm2, %v1074_v62  ;;  %v1568_v14 = vsel %vm1440_vm0, %v1376_v54, %v1504_v4  ;;  %v1507_v15 = vmul.f32 0.01, %v1379_v31  ;;  %v1106_v16 = vadd.f32 %v2773_v52, %v410_v63  ;;  %v1077_v17 = vadd.f32 %v2784_v60, %v381_v0  ;;  %v875_v23 = vpop.f32.mrf.mxu0  ;;  %v1003_v24 = vpop.f32.mrf.mxu1  ;;  %v415_v52 = vld [vmem:[#allocation2 + $0x168] sm:$0xff]  ;;  %v421_v58 = vld [vmem:[#allocation2 + $0x198] sm:$0xff] }
  0xfc   : > { %1891 = vst.msk [vmem:[%s2767_s9 + $0x98] sm:$0xf] %vm1852_vm4, %v2224_v2  ;;  %1857 = vst.msk [vmem:[%s2767_s9 + $0x10] sm:$0xf] %vm1852_vm4, %v2190_v41  ;;  %v2222_v25 = vpack.c.bf16 %v1568_v14, %v1568_v14  ;;  %v1539_v26 = vsel %vm1411_vm1, %v1347_v55, %v1475_v42  ;;  %v1109_v27 = vadd.f32 %v2786_v61, %v413_v5  ;;  %v420_v61 = vld [vmem:[#allocation2 + $0x190] sm:$0xff] }
  0xfd   : > { %v1075_v28 = vadd.f32 %v2788_v6, %v379_v8  ;;  %v2193_v35 = vpack.c.bf16 %v1539_v26, %v1539_v26  ;;  %v1571_v60 = vsel %vm1443_vm3, %v1379_v31, %v1507_v15  ;;  %1171 = vst.msk [vmem:[#allocation2 + $0x140] sm:$0xff] %vm305_vm2, %v1106_v16  ;;  %1142 = vst.msk [vmem:[#allocation2 + $0x58] sm:$0xff] %vm305_vm2, %v1077_v17  ;;  %v2307_v40 = vpop.f32.mrf.mxu0  ;;  %v2864_v6 = vpop.f32.mrf.mxu1 }
  0xfe   : > { %v1107_v36 = vadd.f32 %v2790_v7, %v411_v10  ;;  %v1080_v37 = vadd.f32 %v2798_v18, %v384_v51  ;;  %1889 = vst.msk [vmem:[%s2767_s9 + $0x90] sm:$0xf] %vm1852_vm4, %v2222_v25  ;;  %v2225_v43 = vpack.c.bf16 %v1571_v60, %v1571_v60  ;;  %v1203_v44 = vld [vmem:[#allocation2 + $0x28] sm:$0xff]  ;;  %v1112_v7 = vadd.f32 %v2800_v19, %v416_v13  ;;  %v389_v19 = vld [vmem:[#allocation2 + $0x98] sm:$0xff] }
  0xff   : > { %v1235_v45 = vld [vmem:[#allocation2 + $0x128] sm:$0xff]  ;;  %1174 = vst.msk [vmem:[#allocation2 + $0x158] sm:$0xff] %vm305_vm2, %v1109_v27  ;;  %1140 = vst.msk [vmem:[#allocation2 + $0x48] sm:$0xff] %vm305_vm2, %v1075_v28  ;;  %v1078_v18 = vadd.f32 %v2806_v30, %v382_v20  ;;  %v1110_v46 = vadd.f32 %v2808_v33, %v414_v21  ;;  %v1275_v50 = vmul.f32 %v2729_v1, %v1203_v44  ;;  %v2881_v31 = vpop.f32.mrf.mxu0  ;;  %v2883_v30 = vpop.f32.mrf.mxu1 }
 0x100   : > { %1860 = vst.msk [vmem:[%s2767_s9 + $0x1c] sm:$0xf] %vm1852_vm4, %v2193_v35  ;;  %v1307_v53 = vmul.f32 %v2729_v1, %v1235_v45  ;;  %v1081_v54 = vadd.f32 %v2823_v47, %v385_v22  ;;  %v1113_v55 = vadd.f32 %v2825_v48, %v417_v29  ;;  %1892 = vst.msk [vmem:[%s2767_s9 + $0x9c] sm:$0xf] %vm1852_vm4, %v2225_v43 }
 0x101   : > { %1172 = vst.msk [vmem:[#allocation2 + $0x148] sm:$0xff] %vm305_vm2, %v1107_v36  ;;  %1145 = vst.msk [vmem:[#allocation2 + $0x70] sm:$0xff] %vm305_vm2, %v1080_v37  ;;  %v1079_v33 = vadd.f32 %v2832_v32, %v383_v34  ;;  %v1111_v57 = vadd.f32 %v2834_v56, %v415_v52  ;;  %v1084_v47 = vadd.f32 %v2842_v11, %v388_v38  ;;  %v1208_v63 = vld [vmem:[#allocation2 + $0x50] sm:$0xff]  ;;  %v2898_v4 = vpop.f32.mrf.mxu0  ;;  %v2900_v56 = vpop.f32.mrf.mxu1 }
 0x102   : > { %1177 = vst.msk [vmem:[#allocation2 + $0x170] sm:$0xff] %vm305_vm2, %v1112_v7  ;;  %1143 = vst.msk [vmem:[#allocation2 + $0x60] sm:$0xff] %vm305_vm2, %v1078_v18  ;;  %v1116_v48 = vadd.f32 %v2844_v12, %v420_v61  ;;  %v1345_v59 = vadd.f32 %v2736_v9, %v1275_v50  ;;  %v1377_v62 = vadd.f32 %v2736_v9, %v1307_v53  ;;  %v1240_v0 = vld [vmem:[#allocation2 + $0x150] sm:$0xff]  ;;  %v1206_v2 = vld [vmem:[#allocation2 + $0x40] sm:$0xff] }
 0x103   : > { %1175 = vst.msk [vmem:[#allocation2 + $0x160] sm:$0xff] %vm305_vm2, %v1110_v46  ;;  %1146 = vst.msk [vmem:[#allocation2 + $0x78] sm:$0xff] %vm305_vm2, %v1081_v54  ;;  %v1082_v3 = vadd.f32 %v875_v23, %v386_v39  ;;  %v1114_v32 = vadd.f32 %v1003_v24, %v418_v49  ;;  %v1280_v5 = vmul.f32 %v2729_v1, %v1208_v63  ;;  %v2911_v42 = vpop.f32.mrf.mxu0  ;;  %v2913_v51 = vpop.f32.mrf.mxu1 }
 0x104   : > { %1178 = vst.msk [vmem:[#allocation2 + $0x178] sm:$0xff] %vm305_vm2, %v1113_v55  ;;  %v1312_v8 = vmul.f32 %v2729_v1, %v1240_v0  ;;  %v1278_v10 = vmul.f32 %v2729_v1, %v1206_v2  ;;  %1144 = vst.msk [vmem:[#allocation2 + $0x68] sm:$0xff] %vm305_vm2, %v1079_v33  ;;  %v1085_v11 = vadd.f32 %v2307_v40, %v389_v19  ;;  %vm1409_vm5 = vcmp.gt.f32.partialorder %v1345_v59, 0.0  ;;  %v1238_v16 = vld [vmem:[#allocation2 + $0x140] sm:$0xff]  ;;  %v1209_v17 = vld [vmem:[#allocation2 + $0x58] sm:$0xff] }
 0x105   : > { %1176 = vst.msk [vmem:[#allocation2 + $0x168] sm:$0xff] %vm305_vm2, %v1111_v57  ;;  %1149 = vst.msk [vmem:[#allocation2 + $0x90] sm:$0xff] %vm305_vm2, %v1084_v47  ;;  %v1473_v12 = vmul.f32 0.01, %v1345_v59  ;;  %vm1441_vm6 = vcmp.gt.f32.partialorder %v1377_v62, 0.0  ;;  %v1350_v13 = vadd.f32 %v2736_v9, %v1280_v5  ;;  %v1117_v20 = vadd.f32 %v2864_v6, %v421_v58  ;;  %v2922_v26 = vpop.f32.mrf.mxu0  ;;  %v2924_v27 = vpop.f32.mrf.mxu1 }
 0x106   : > { %1181 = vst.msk [vmem:[#allocation2 + $0x190] sm:$0xff] %vm305_vm2, %v1116_v48  ;;  %v1505_v41 = vmul.f32 0.01, %v1377_v62  ;;  %1147 = vst.msk [vmem:[#allocation2 + $0x80] sm:$0xff] %vm305_vm2, %v1082_v3  ;;  %v1382_v14 = vadd.f32 %v2736_v9, %v1312_v8  ;;  %v1348_v15 = vadd.f32 %v2736_v9, %v1278_v10  ;;  %v1310_v23 = vmul.f32 %v2729_v1, %v1238_v16  ;;  %v1241_v25 = vld [vmem:[#allocation2 + $0x158] sm:$0xff]  ;;  %v1207_v52 = vld [vmem:[#allocation2 + $0x48] sm:$0xff] }
 0x107   : > { %1179 = vst.msk [vmem:[#allocation2 + $0x180] sm:$0xff] %vm305_vm2, %v1114_v32  ;;  %1150 = vst.msk [vmem:[#allocation2 + $0x98] sm:$0xff] %vm305_vm2, %v1085_v11  ;;  %v1537_v21 = vsel %vm1409_vm5, %v1345_v59, %v1473_v12  ;;  %v1281_v24 = vmul.f32 %v2729_v1, %v1209_v17  ;;  %vm1414_vm7 = vcmp.gt.f32.partialorder %v1350_v13, 0.0  ;;  %v1478_v34 = vmul.f32 0.01, %v1350_v13  ;;  %v2935_v18 = vpop.f32.mrf.mxu0  ;;  %v2937_v46 = vpop.f32.mrf.mxu1 }
 0x108   : > { %v1569_v22 = vsel %vm1441_vm6, %v1377_v62, %v1505_v41  ;;  %v2191_v28 = vpack.c.bf16 %v1537_v21, %v1537_v21  ;;  %1182 = vst.msk [vmem:[#allocation2 + $0x198] sm:$0xff] %vm305_vm2, %v1117_v20  ;;  %vm1446_vm8 = vcmp.gt.f32.partialorder %v1382_v14, 0.0  ;;  %v1510_v35 = vmul.f32 0.01, %v1382_v14  ;;  %v1239_v44 = vld [vmem:[#allocation2 + $0x148] sm:$0xff]  ;;  %v1212_v45 = vld [vmem:[#allocation2 + $0x70] sm:$0xff] }
 0x109   : > { %v2223_v29 = vpack.c.bf16 %v1569_v22, %v1569_v22  ;;  %vm1412_vm9 = vcmp.gt.f32.partialorder %v1348_v15, 0.0  ;;  %v1476_v60 = vmul.f32 0.01, %v1348_v15  ;;  %v1542_v36 = vsel %vm1414_vm7, %v1350_v13, %v1478_v34  ;;  %v1244_v7 = vld [vmem:[#allocation2 + $0x170] sm:$0xff]  ;;  %v1210_v58 = vld [vmem:[#allocation2 + $0x60] sm:$0xff]  ;;  %v2950_v0 = vpop.f32.mrf.mxu0  ;;  %v2952_v2 = vpop.f32.mrf.mxu1 }
 0x10a   : > { %1858 = vst.msk [vmem:[%s2767_s9 + $0x14] sm:$0xf] %vm1852_vm4, %v2191_v28  ;;  %v1380_v37 = vadd.f32 %v2736_v9, %v1310_v23  ;;  %v1351_v38 = vadd.f32 %v2736_v9, %v1281_v24  ;;  %v1313_v61 = vmul.f32 %v2729_v1, %v1241_v25  ;;  %v2196_v39 = vpack.c.bf16 %v1542_v36, %v1542_v36  ;;  %v1242_v41 = vld [vmem:[#allocation2 + $0x160] sm:$0xff]  ;;  %v1213_v16 = vld [vmem:[#allocation2 + $0x78] sm:$0xff] }
 0x10b   : > { %1890 = vst.msk [vmem:[%s2767_s9 + $0x94] sm:$0xf] %vm1852_vm4, %v2223_v29  ;;  %v1574_v40 = vsel %vm1446_vm8, %v1382_v14, %v1510_v35  ;;  %v1540_v6 = vsel %vm1412_vm9, %v1348_v15, %v1476_v60  ;;  %v1279_v43 = vmul.f32 %v2729_v1, %v1207_v52  ;;  %v1311_v57 = vmul.f32 %v2729_v1, %v1239_v44  ;;  %v1245_v17 = vld [vmem:[#allocation2 + $0x178] sm:$0xff]  ;;  %v2962_v22 = vpop.f32.mrf.mxu0  ;;  %v2964_v23 = vpop.f32.mrf.mxu1  ;;  %v1211_v36 = vld [vmem:[#allocation2 + $0x68] sm:$0xff] }
 0x10c   : > { %v2228_v49 = vpack.c.bf16 %v1574_v40, %v1574_v40  ;;  %v2194_v50 = vpack.c.bf16 %v1540_v6, %v1540_v6  ;;  %vm1444_vm10 = vcmp.gt.f32.partialorder %v1380_v37, 0.0  ;;  %v1508_v53 = vmul.f32 0.01, %v1380_v37  ;;  %1863 = vst.msk [vmem:[%s2767_s9 + $0x28] sm:$0xf] %vm1852_vm4, %v2196_v39 }
 0x10d   : > { %vm1415_vm11 = vcmp.gt.f32.partialorder %v1351_v38, 0.0  ;;  %v1479_v54 = vmul.f32 0.01, %v1351_v38  ;;  %v1383_v55 = vadd.f32 %v2736_v9, %v1313_v61  ;;  %v1349_v19 = vadd.f32 %v2736_v9, %v1279_v43 }
 0x10e   : > { %1895 = vst.msk [vmem:[%s2767_s9 + $0xa8] sm:$0xf] %vm1852_vm4, %v2228_v49  ;;  %1861 = vst.msk [vmem:[%s2767_s9 + $0x20] sm:$0xf] %vm1852_vm4, %v2194_v50  ;;  %v1572_v33 = vsel %vm1444_vm10, %v1380_v37, %v1508_v53  ;;  %v1284_v47 = vmul.f32 %v2729_v1, %v1212_v45  ;;  %v1316_v48 = vmul.f32 %v2729_v1, %v1244_v7  ;;  %v1243_v37 = vld [vmem:[#allocation2 + $0x168] sm:$0xff]  ;;  %v2980_v7 = vpop.f32.mrf.mxu0  ;;  %v2982_v49 = vpop.f32.mrf.mxu1 }
 0x10f   : > { %v2226_v59 = vpack.c.bf16 %v1572_v33, %v1572_v33  ;;  %v1543_v62 = vsel %vm1415_vm11, %v1351_v38, %v1479_v54  ;;  %vm1447_vm12 = vcmp.gt.f32.partialorder %v1383_v55, 0.0  ;;  %v1511_v63 = vmul.f32 0.01, %v1383_v55  ;;  %v1216_v38 = vld [vmem:[#allocation2 + $0x90] sm:$0xff] }
 0x110   : > { %v2197_v3 = vpack.c.bf16 %v1543_v62, %v1543_v62  ;;  %vm1413_vm13 = vcmp.gt.f32.partialorder %v1349_v19, 0.0  ;;  %v1477_v32 = vmul.f32 0.01, %v1349_v19  ;;  %v1381_v5 = vadd.f32 %v2736_v9, %v1311_v57 }
 0x111   : > { %1893 = vst.msk [vmem:[%s2767_s9 + $0xa0] sm:$0xf] %vm1852_vm4, %v2226_v59  ;;  %v1575_v8 = vsel %vm1447_vm12, %v1383_v55, %v1511_v63  ;;  %v1354_v10 = vadd.f32 %v2736_v9, %v1284_v47  ;;  %v1386_v11 = vadd.f32 %v2736_v9, %v1316_v48  ;;  %v1282_v12 = vmul.f32 %v2729_v1, %v1210_v58 }
 0x112   : > { %1864 = vst.msk [vmem:[%s2767_s9 + $0x2c] sm:$0xf] %vm1852_vm4, %v2197_v3  ;;  %v2229_v13 = vpack.c.bf16 %v1575_v8, %v1575_v8  ;;  %v1541_v14 = vsel %vm1413_vm13, %v1349_v19, %v1477_v32  ;;  %vm1445_vm14 = vcmp.gt.f32.partialorder %v1381_v5, 0.0  ;;  %v1509_v15 = vmul.f32 0.01, %v1381_v5  ;;  %v1248_v19 = vld [vmem:[#allocation2 + $0x190] sm:$0xff]  ;;  %v2997_v32 = vpop.f32.mrf.mxu0 }
 0x113   : > { %v2195_v20 = vpack.c.bf16 %v1541_v14, %v1541_v14  ;;  %vm1418_vm15 = vcmp.gt.f32.partialorder %v1354_v10, 0.0  ;;  %v1482_v21 = vmul.f32 0.01, %v1354_v10  ;;  %vm1450_vm0 = vcmp.gt.f32.partialorder %v1386_v11, 0.0 }
 0x114   : > { %1896 = vst.msk [vmem:[%s2767_s9 + $0xac] sm:$0xf] %vm1852_vm4, %v2229_v13  ;;  %v1573_v24 = vsel %vm1445_vm14, %v1381_v5, %v1509_v15  ;;  %v1514_v25 = vmul.f32 0.01, %v1386_v11  ;;  %v1352_v28 = vadd.f32 %v2736_v9, %v1282_v12  ;;  %v1314_v29 = vmul.f32 %v2729_v1, %v1242_v41  ;;  %v2999_v5 = vpop.f32.mrf.mxu1  ;;  %v1214_v12 = vld [vmem:[#allocation2 + $0x80] sm:$0xff]  ;;  %v1217_v13 = vld [vmem:[#allocation2 + $0x98] sm:$0xff] }
 0x115   : > { %1862 = vst.msk [vmem:[%s2767_s9 + $0x24] sm:$0xf] %vm1852_vm4, %v2195_v20  ;;  %v2227_v34 = vpack.c.bf16 %v1573_v24, %v1573_v24  ;;  %v1546_v52 = vsel %vm1418_vm15, %v1354_v10, %v1482_v21  ;;  %v1285_v35 = vmul.f32 %v2729_v1, %v1213_v16  ;;  %v1317_v60 = vmul.f32 %v2729_v1, %v1245_v17  ;;  %v1246_v41 = vld [vmem:[#allocation2 + $0x180] sm:$0xff] }
 0x116   : > { %v2200_v61 = vpack.c.bf16 %v1546_v52, %v1546_v52  ;;  %v1578_v39 = vsel %vm1450_vm0, %v1386_v11, %v1514_v25  ;;  %vm1416_vm1 = vcmp.gt.f32.partialorder %v1352_v28, 0.0  ;;  %v1480_v40 = vmul.f32 0.01, %v1352_v28  ;;  %v387_v52 = vld [vmem:[#allocation2 + $0x88] sm:$0xff] }
 0x117   : > { %1894 = vst.msk [vmem:[%s2767_s9 + $0xa4] sm:$0xf] %vm1852_vm4, %v2227_v34  ;;  %v2232_v6 = vpack.c.bf16 %v1578_v39, %v1578_v39  ;;  %v1384_v43 = vadd.f32 %v2736_v9, %v1314_v29  ;;  %v1355_v44 = vadd.f32 %v2736_v9, %v1285_v35  ;;  %v1387_v45 = vadd.f32 %v2736_v9, %v1317_v60  ;;  %v1249_v34 = vld [vmem:[#allocation2 + $0x198] sm:$0xff]  ;;  %v3011_v35 = vpop.f32.mrf.mxu0  ;;  %v3013_v60 = vpop.f32.mrf.mxu1 }
 0x118   : > { %1867 = vst.msk [vmem:[%s2767_s9 + $0x38] sm:$0xf] %vm1852_vm4, %v2200_v61  ;;  %v1544_v50 = vsel %vm1416_vm1, %v1352_v28, %v1480_v40  ;;  %v1283_v53 = vmul.f32 %v2729_v1, %v1211_v36  ;;  %v1315_v54 = vmul.f32 %v2729_v1, %v1243_v37  ;;  %v1288_v55 = vmul.f32 %v2729_v1, %v1216_v38  ;;  %v419_v61 = vld [vmem:[#allocation2 + $0x188] sm:$0xff] }
 0x119   : > { %1899 = vst.msk [vmem:[%s2767_s9 + $0xb8] sm:$0xf] %vm1852_vm4, %v2232_v6  ;;  %v2198_v33 = vpack.c.bf16 %v1544_v50, %v1544_v50  ;;  %vm1448_vm3 = vcmp.gt.f32.partialorder %v1384_v43, 0.0  ;;  %v1512_v57 = vmul.f32 0.01, %v1384_v43  ;;  %vm1419_vm5 = vcmp.gt.f32.partialorder %v1355_v44, 0.0 }
 0x11a   : > { %v1483_v47 = vmul.f32 0.01, %v1355_v44  ;;  %vm1451_vm6 = vcmp.gt.f32.partialorder %v1387_v45, 0.0  ;;  %v1515_v48 = vmul.f32 0.01, %v1387_v45  ;;  %v1353_v58 = vadd.f32 %v2736_v9, %v1283_v53 }
 0x11b   : > { %1865 = vst.msk [vmem:[%s2767_s9 + $0x30] sm:$0xf] %vm1852_vm4, %v2198_v33  ;;  %v1576_v59 = vsel %vm1448_vm3, %v1384_v43, %v1512_v57  ;;  %v1385_v62 = vadd.f32 %v2736_v9, %v1315_v54  ;;  %v1358_v63 = vadd.f32 %v2736_v9, %v1288_v55  ;;  %v1320_v3 = vmul.f32 %v2729_v1, %v1248_v19  ;;  %v392_v54 = vld [vmem:[#allocation2 + $0xb0] sm:$0xff] }
 0x11c   : > { %v2230_v8 = vpack.c.bf16 %v1576_v59, %v1576_v59  ;;  %v1547_v10 = vsel %vm1419_vm5, %v1355_v44, %v1483_v47  ;;  %v1579_v11 = vsel %vm1451_vm6, %v1387_v45, %v1515_v48  ;;  %vm1417_vm7 = vcmp.gt.f32.partialorder %v1353_v58, 0.0  ;;  %v424_v57 = vld [vmem:[#allocation2 + $0x1b0] sm:$0xff]  ;;  %v390_v47 = vld [vmem:[#allocation2 + $0xa0] sm:$0xff]  ;;  %v3028_v48 = vpop.f32.mrf.mxu0 }
 0x11d   : > { %v2201_v14 = vpack.c.bf16 %v1547_v10, %v1547_v10  ;;  %v2233_v15 = vpack.c.bf16 %v1579_v11, %v1579_v11  ;;  %v1481_v16 = vmul.f32 0.01, %v1353_v58  ;;  %vm1449_vm8 = vcmp.gt.f32.partialorder %v1385_v62, 0.0  ;;  %v393_v10 = vld [vmem:[#allocation2 + $0xb8] sm:$0xff] }
 0x11e   : > { %1897 = vst.msk [vmem:[%s2767_s9 + $0xb0] sm:$0xf] %vm1852_vm4, %v2230_v8  ;;  %v1513_v17 = vmul.f32 0.01, %v1385_v62  ;;  %vm1422_vm9 = vcmp.gt.f32.partialorder %v1358_v63, 0.0  ;;  %v1390_v21 = vadd.f32 %v2736_v9, %v1320_v3  ;;  %v1286_v25 = vmul.f32 %v2729_v1, %v1214_v12  ;;  %v425_v11 = vld [vmem:[#allocation2 + $0x1b8] sm:$0xff] }
 0x11f   : > { %v1486_v20 = vmul.f32 0.01, %v1358_v63  ;;  %1868 = vst.msk [vmem:[%s2767_s9 + $0x3c] sm:$0xf] %vm1852_vm4, %v2201_v14  ;;  %1900 = vst.msk [vmem:[%s2767_s9 + $0xbc] sm:$0xf] %vm1852_vm4, %v2233_v15  ;;  %v1545_v24 = vsel %vm1417_vm7, %v1353_v58, %v1481_v16  ;;  %v1318_v28 = vmul.f32 %v2729_v1, %v1246_v41  ;;  %v1289_v29 = vmul.f32 %v2729_v1, %v1217_v13  ;;  %v3030_v58 = vpop.f32.mrf.mxu1 }
 0x120   : > { %v2199_v36 = vpack.c.bf16 %v1545_v24, %v1545_v24  ;;  %v1577_v37 = vsel %vm1449_vm8, %v1385_v62, %v1513_v17  ;;  %vm1454_vm10 = vcmp.gt.f32.partialorder %v1390_v21, 0.0  ;;  %v1518_v6 = vmul.f32 0.01, %v1390_v21  ;;  %v422_v62 = vld [vmem:[#allocation2 + $0x1a0] sm:$0xff]  ;;  %v391_v12 = vld [vmem:[#allocation2 + $0xa8] sm:$0xff]  ;;  %v396_v17 = vld [vmem:[#allocation2 + $0xd0] sm:$0xff] }
 0x121   : > { %v1550_v38 = vsel %vm1422_vm9, %v1358_v63, %v1486_v20  ;;  %v2231_v39 = vpack.c.bf16 %v1577_v37, %v1577_v37  ;;  %v1356_v43 = vadd.f32 %v2736_v9, %v1286_v25  ;;  %v1388_v44 = vadd.f32 %v2736_v9, %v1318_v28  ;;  %v423_v16 = vld [vmem:[#allocation2 + $0x1a8] sm:$0xff]  ;;  %v428_v20 = vld [vmem:[#allocation2 + $0x1d0] sm:$0xff]  ;;  %v394_v24 = vld [vmem:[#allocation2 + $0xc0] sm:$0xff] }
 0x122   : > { %v2204_v40 = vpack.c.bf16 %v1550_v38, %v1550_v38  ;;  %1866 = vst.msk [vmem:[%s2767_s9 + $0x34] sm:$0xf] %vm1852_vm4, %v2199_v36  ;;  %v1359_v45 = vadd.f32 %v2736_v9, %v1289_v29  ;;  %v1321_v50 = vmul.f32 %v2729_v1, %v1249_v34  ;;  %v1083_v53 = vadd.f32 %v2881_v31, %v387_v52  ;;  %v426_v25 = vld [vmem:[#allocation2 + $0x1c0] sm:$0xff]  ;;  %v397_v28 = vld [vmem:[#allocation2 + $0xd8] sm:$0xff]  ;;  %v2319_v29 = vpop.f32.mrf.mxu0  ;;  %v2351_v34 = vpop.f32.mrf.mxu1  ;;  %v395_v38 = vld [vmem:[#allocation2 + $0xc8] sm:$0xff] }
 0x123   : > { %1898 = vst.msk [vmem:[%s2767_s9 + $0xb4] sm:$0xf] %vm1852_vm4, %v2231_v39  ;;  %v1582_v55 = vsel %vm1454_vm10, %v1390_v21, %v1518_v6  ;;  %vm1420_vm11 = vcmp.gt.f32.partialorder %v1356_v43, 0.0  ;;  %v1484_v19 = vmul.f32 0.01, %v1356_v43  ;;  %v1115_v33 = vadd.f32 %v2883_v30, %v419_v61  ;;  %v429_v37 = vld [vmem:[#allocation2 + $0x1d8] sm:$0xff] }
 0x124   : > { %1871 = vst.msk [vmem:[%s2767_s9 + $0x48] sm:$0xf] %vm1852_vm4, %v2204_v40  ;;  %v2236_v59 = vpack.c.bf16 %v1582_v55, %v1582_v55  ;;  %vm1452_vm12 = vcmp.gt.f32.partialorder %v1388_v44, 0.0  ;;  %v1516_v31 = vmul.f32 0.01, %v1388_v44  ;;  %vm1423_vm13 = vcmp.gt.f32.partialorder %v1359_v45, 0.0 }
 0x125   : > { %1148 = vst.msk [vmem:[#allocation2 + $0x88] sm:$0xff] %vm305_vm2, %v1083_v53  ;;  %v1548_v63 = vsel %vm1420_vm11, %v1356_v43, %v1484_v19  ;;  %v1487_v3 = vmul.f32 0.01, %v1359_v45  ;;  %v1391_v8 = vadd.f32 %v2736_v9, %v1321_v50  ;;  %1180 = vst.msk [vmem:[#allocation2 + $0x188] sm:$0xff] %vm305_vm2, %v1115_v33  ;;  %v1088_v30 = vadd.f32 %v2898_v4, %v392_v54  ;;  %v427_v61 = vld [vmem:[#allocation2 + $0x1c8] sm:$0xff]  ;;  %v401_v50 = vld [vmem:[#allocation2 + $0xf8] sm:$0xff]  ;;  %v926_v33 = vpop.f32.mrf.mxu0 }
 0x126   : > { %1903 = vst.msk [vmem:[%s2767_s9 + $0xc8] sm:$0xf] %vm1852_vm4, %v2236_v59  ;;  %v2202_v41 = vpack.c.bf16 %v1548_v63, %v1548_v63  ;;  %v1580_v13 = vsel %vm1452_vm12, %v1388_v44, %v1516_v31  ;;  %v1120_v14 = vadd.f32 %v2900_v56, %v424_v57  ;;  %v1086_v15 = vadd.f32 %v2911_v42, %v390_v47  ;;  %v400_v44 = vld [vmem:[#allocation2 + $0xf0] sm:$0xff]  ;;  %v433_v53 = vld [vmem:[#allocation2 + $0x1f8] sm:$0xff]  ;;  %v431_v57 = vld [vmem:[#allocation2 + $0x1e8] sm:$0xff]  ;;  %v1054_v47 = vpop.f32.mrf.mxu1 }
 0x127   : > { %v2234_v9 = vpack.c.bf16 %v1580_v13, %v1580_v13  ;;  %v1551_v21 = vsel %vm1423_vm13, %v1359_v45, %v1487_v3  ;;  %vm1455_vm14 = vcmp.gt.f32.partialorder %v1391_v8, 0.0  ;;  %v1519_v4 = vmul.f32 0.01, %v1391_v8  ;;  %1153 = vst.msk [vmem:[#allocation2 + $0xb0] sm:$0xff] %vm305_vm2, %v1088_v30  ;;  %v432_v45 = vld [vmem:[#allocation2 + $0x1f0] sm:$0xff] }
 0x128   : > { %1869 = vst.msk [vmem:[%s2767_s9 + $0x40] sm:$0xf] %vm1852_vm4, %v2202_v41  ;;  %v2205_v56 = vpack.c.bf16 %v1551_v21, %v1551_v21  ;;  %v1118_v42 = vadd.f32 %v2913_v51, %v422_v62  ;;  %v1089_v52 = vadd.f32 %v2922_v26, %v393_v10  ;;  %v1121_v36 = vadd.f32 %v2924_v27, %v425_v11  ;;  %v398_v51 = vld [vmem:[#allocation2 + $0xe0] sm:$0xff] }
 0x129   : > { %1185 = vst.msk [vmem:[#allocation2 + $0x1b0] sm:$0xff] %vm305_vm2, %v1120_v14  ;;  %1151 = vst.msk [vmem:[#allocation2 + $0xa0] sm:$0xff] %vm305_vm2, %v1086_v15  ;;  %v1583_v39 = vsel %vm1455_vm14, %v1391_v8, %v1519_v4  ;;  %v1087_v40 = vadd.f32 %v2935_v18, %v391_v12  ;;  %v1119_v6 = vadd.f32 %v2937_v46, %v423_v16 }
 0x12a   : > { %1901 = vst.msk [vmem:[%s2767_s9 + $0xc0] sm:$0xf] %vm1852_vm4, %v2234_v9  ;;  %v1092_v43 = vadd.f32 %v2950_v0, %v396_v17  ;;  %1872 = vst.msk [vmem:[%s2767_s9 + $0x4c] sm:$0xf] %vm1852_vm4, %v2205_v56  ;;  %v2237_v26 = vpack.c.bf16 %v1583_v39, %v1583_v39  ;;  %v1124_v27 = vadd.f32 %v2952_v2, %v428_v20  ;;  %v430_v0 = vld [vmem:[#allocation2 + $0x1e0] sm:$0xff] }
 0x12b   : > { %1183 = vst.msk [vmem:[#allocation2 + $0x1a0] sm:$0xff] %vm305_vm2, %v1118_v42  ;;  %1154 = vst.msk [vmem:[#allocation2 + $0xb8] sm:$0xff] %vm305_vm2, %v1089_v52  ;;  %v1090_v18 = vadd.f32 %v2962_v22, %v394_v24  ;;  %v1122_v46 = vadd.f32 %v2964_v23, %v426_v25  ;;  %v1093_v55 = vadd.f32 %v2980_v7, %v397_v28  ;;  %v399_v23 = vld [vmem:[#allocation2 + $0xe8] sm:$0xff] }
 0x12c   : > { %1186 = vst.msk [vmem:[#allocation2 + $0x1b8] sm:$0xff] %vm305_vm2, %v1121_v36  ;;  %v1215_v54 = vld [vmem:[#allocation2 + $0x88] sm:$0xff]  ;;  %1152 = vst.msk [vmem:[#allocation2 + $0xa8] sm:$0xff] %vm305_vm2, %v1087_v40  ;;  %v1125_v19 = vadd.f32 %v2982_v49, %v429_v37  ;;  %v1091_v2 = vadd.f32 %v2997_v32, %v395_v38  ;;  %v1123_v22 = vadd.f32 %v2999_v5, %v427_v61  ;;  %v3082_v5 = vld [vmem:[%s3216_s2] ss:$0 sm:$0xff] }
 0x12d   : > { %1184 = vst.msk [vmem:[#allocation2 + $0x1a8] sm:$0xff] %vm305_vm2, %v1119_v6  ;;  %1157 = vst.msk [vmem:[#allocation2 + $0xd0] sm:$0xff] %vm305_vm2, %v1092_v43  ;;  %v1287_v59 = vmul.f32 %v2729_v1, %v1215_v54  ;;  %v1247_v31 = vld [vmem:[#allocation2 + $0x188] sm:$0xff]  ;;  %v1096_v7 = vadd.f32 %v3011_v35, %v400_v44  ;;  %v1128_v49 = vadd.f32 %v3013_v60, %v432_v45 }
 0x12e   : > { %1904 = vst.msk [vmem:[%s2767_s9 + $0xcc] sm:$0xf] %vm1852_vm4, %v2237_v26  ;;  %v1094_v32 = vadd.f32 %v3028_v48, %v398_v51  ;;  %v1319_v1 = vmul.f32 %v3082_v5, %v1247_v31  ;;  %v1126_v35 = vadd.f32 %v3030_v58, %v430_v0  ;;  %v1097_v60 = vadd.f32 %v2319_v29, %v401_v50  ;;  %v3093_v48 = vld [vmem:[%s3217_s3] ss:$0 sm:$0xff]  ;;  %v1220_v3 = vld [vmem:[#allocation2 + $0xb0] sm:$0xff] }
 0x12f   : > { %1189 = vst.msk [vmem:[#allocation2 + $0x1d0] sm:$0xff] %vm305_vm2, %v1124_v27  ;;  %1155 = vst.msk [vmem:[#allocation2 + $0xc0] sm:$0xff] %vm305_vm2, %v1090_v18  ;;  %v1129_v62 = vadd.f32 %v2351_v34, %v433_v53  ;;  %v1357_v63 = vadd.f32 %v3093_v48, %v1287_v59  ;;  %v1095_v8 = vadd.f32 %v926_v33, %v399_v23 }
 0x130   : > { %1187 = vst.msk [vmem:[#allocation2 + $0x1c0] sm:$0xff] %vm305_vm2, %v1122_v46  ;;  %1158 = vst.msk [vmem:[#allocation2 + $0xd8] sm:$0xff] %vm305_vm2, %v1093_v55  ;;  %v1127_v30 = vadd.f32 %v1054_v47, %v431_v57  ;;  %v1389_v58 = vadd.f32 %v3093_v48, %v1319_v1  ;;  %v1292_v10 = vmul.f32 %v3082_v5, %v1220_v3  ;;  %v1252_v11 = vld [vmem:[#allocation2 + $0x1b0] sm:$0xff]  ;;  %v1218_v12 = vld [vmem:[#allocation2 + $0xa0] sm:$0xff] }
 0x131   : > { %1190 = vst.msk [vmem:[#allocation2 + $0x1d8] sm:$0xff] %vm305_vm2, %v1125_v19  ;;  %1156 = vst.msk [vmem:[#allocation2 + $0xc8] sm:$0xff] %vm305_vm2, %v1091_v2  ;;  %vm1421_vm15 = vcmp.gt.f32.partialorder %v1357_v63, 0.0  ;;  %v1485_v41 = vmul.f32 0.01, %v1357_v63  ;;  %v1324_v13 = vmul.f32 %v3082_v5, %v1252_v11  ;;  %v1290_v14 = vmul.f32 %v3082_v5, %v1218_v12 }
 0x132   : > { %1188 = vst.msk [vmem:[#allocation2 + $0x1c8] sm:$0xff] %vm305_vm2, %v1123_v22  ;;  %1161 = vst.msk [vmem:[#allocation2 + $0xf0] sm:$0xff] %vm305_vm2, %v1096_v7  ;;  %vm1453_vm0 = vcmp.gt.f32.partialorder %v1389_v58, 0.0  ;;  %v1517_v15 = vmul.f32 0.01, %v1389_v58  ;;  %v1362_v16 = vadd.f32 %v3093_v48, %v1292_v10  ;;  %v1250_v17 = vld [vmem:[#allocation2 + $0x1a0] sm:$0xff] }
 0x133   : > { %1193 = vst.msk [vmem:[#allocation2 + $0x1f0] sm:$0xff] %vm305_vm2, %v1128_v49  ;;  %1159 = vst.msk [vmem:[#allocation2 + $0xe0] sm:$0xff] %vm305_vm2, %v1094_v32  ;;  %v1549_v20 = vsel %vm1421_vm15, %v1357_v63, %v1485_v41  ;;  %v1394_v9 = vadd.f32 %v3093_v48, %v1324_v13  ;;  %v1360_v21 = vadd.f32 %v3093_v48, %v1290_v14  ;;  %v1221_v24 = vld [vmem:[#allocation2 + $0xb8] sm:$0xff]  ;;  %v1219_v56 = vld [vmem:[#allocation2 + $0xa8] sm:$0xff] }
 0x134   : > { %1191 = vst.msk [vmem:[#allocation2 + $0x1e0] sm:$0xff] %vm305_vm2, %v1126_v35  ;;  %1162 = vst.msk [vmem:[#allocation2 + $0xf8] sm:$0xff] %vm305_vm2, %v1097_v60  ;;  %v1322_v4 = vmul.f32 %v3082_v5, %v1250_v17  ;;  %v2203_v25 = vpack.c.bf16 %v1549_v20, %v1549_v20  ;;  %v1581_v28 = vsel %vm1453_vm0, %v1389_v58, %v1517_v15  ;;  %vm1426_vm1 = vcmp.gt.f32.partialorder %v1362_v16, 0.0  ;;  %v1253_v34 = vld [vmem:[#allocation2 + $0x1b8] sm:$0xff]  ;;  %v1251_v44 = vld [vmem:[#allocation2 + $0x1a8] sm:$0xff] }
 0x135   : > { %1194 = vst.msk [vmem:[#allocation2 + $0x1f8] sm:$0xff] %vm305_vm2, %v1129_v62  ;;  %1160 = vst.msk [vmem:[#allocation2 + $0xe8] sm:$0xff] %vm305_vm2, %v1095_v8  ;;  %v1490_v29 = vmul.f32 0.01, %v1362_v16  ;;  %v2235_v42 = vpack.c.bf16 %v1581_v28, %v1581_v28  ;;  %v1522_v52 = vmul.f32 0.01, %v1394_v9  ;;  %v1293_v61 = vmul.f32 %v3082_v5, %v1221_v24 }
 0x136   : > { %1192 = vst.msk [vmem:[#allocation2 + $0x1e8] sm:$0xff] %vm305_vm2, %v1127_v30  ;;  %vm1458_vm2 = vcmp.gt.f32.partialorder %v1394_v9, 0.0  ;;  %vm1424_vm3 = vcmp.gt.f32.partialorder %v1360_v21, 0.0  ;;  %v1488_v37 = vmul.f32 0.01, %v1360_v21  ;;  %v1392_v38 = vadd.f32 %v3093_v48, %v1322_v4  ;;  %v1224_v45 = vld [vmem:[#allocation2 + $0xd0] sm:$0xff] }
 0x137   : > { %1870 = vst.msk [vmem:[%s2767_s9 + $0x44] sm:$0xf] %vm1852_vm4, %v2203_v25  ;;  %v1554_v36 = vsel %vm1426_vm1, %v1362_v16, %v1490_v29  ;;  %1902 = vst.msk [vmem:[%s2767_s9 + $0xc4] sm:$0xf] %vm1852_vm4, %v2235_v42  ;;  %v1586_v40 = vsel %vm1458_vm2, %v1394_v9, %v1522_v52  ;;  %v1325_v6 = vmul.f32 %v3082_v5, %v1253_v34  ;;  %v1256_v51 = vld [vmem:[#allocation2 + $0x1d0] sm:$0xff]  ;;  %v1222_v22 = vld [vmem:[#allocation2 + $0xc0] sm:$0xff] }
 0x138   : > { %v2208_v39 = vpack.c.bf16 %v1554_v36, %v1554_v36  ;;  %v1291_v43 = vmul.f32 %v3082_v5, %v1219_v56  ;;  %v2240_v26 = vpack.c.bf16 %v1586_v40, %v1586_v40  ;;  %v1552_v27 = vsel %vm1424_vm3, %v1360_v21, %v1488_v37  ;;  %v1254_v62 = vld [vmem:[#allocation2 + $0x1c0] sm:$0xff]  ;;  %v1225_v63 = vld [vmem:[#allocation2 + $0xd8] sm:$0xff]  ;;  %v1223_v16 = vld [vmem:[#allocation2 + $0xc8] sm:$0xff] }
 0x139   : > { %vm1456_vm5 = vcmp.gt.f32.partialorder %v1392_v38, 0.0  ;;  %v1520_v18 = vmul.f32 0.01, %v1392_v38  ;;  %v2206_v46 = vpack.c.bf16 %v1552_v27, %v1552_v27  ;;  %v1363_v0 = vadd.f32 %v3093_v48, %v1293_v61  ;;  %v1257_v3 = vld [vmem:[#allocation2 + $0x1d8] sm:$0xff]  ;;  %v1255_v17 = vld [vmem:[#allocation2 + $0x1c8] sm:$0xff]  ;;  %v1228_v4 = vld [vmem:[#allocation2 + $0xf0] sm:$0xff] }
 0x13a   : > { %1875 = vst.msk [vmem:[%s2767_s9 + $0x58] sm:$0xf] %vm1852_vm4, %v2208_v39  ;;  %v1395_v50 = vadd.f32 %v3093_v48, %v1325_v6  ;;  %v1361_v53 = vadd.f32 %v3093_v48, %v1291_v43  ;;  %1907 = vst.msk [vmem:[%s2767_s9 + $0xd8] sm:$0xf] %vm1852_vm4, %v2240_v26  ;;  %v1323_v55 = vmul.f32 %v3082_v5, %v1251_v44  ;;  %v1260_v61 = vld [vmem:[#allocation2 + $0x1f0] sm:$0xff] }
 0x13b   : > { %v1584_v54 = vsel %vm1456_vm5, %v1392_v38, %v1520_v18  ;;  %v1296_v19 = vmul.f32 %v3082_v5, %v1224_v45  ;;  %v1328_v2 = vmul.f32 %v3082_v5, %v1256_v51  ;;  %1873 = vst.msk [vmem:[%s2767_s9 + $0x50] sm:$0xf] %vm1852_vm4, %v2206_v46  ;;  %vm1427_vm6 = vcmp.gt.f32.partialorder %v1363_v0, 0.0  ;;  %v1226_v46 = vld [vmem:[#allocation2 + $0xe0] sm:$0xff] }
 0x13c   : > { %v2238_v23 = vpack.c.bf16 %v1584_v54, %v1584_v54  ;;  %v1491_v33 = vmul.f32 0.01, %v1363_v0  ;;  %vm1459_vm7 = vcmp.gt.f32.partialorder %v1395_v50, 0.0  ;;  %v1523_v57 = vmul.f32 0.01, %v1395_v50  ;;  %v1258_v54 = vld [vmem:[#allocation2 + $0x1e0] sm:$0xff] }
 0x13d   : > { %vm1425_vm8 = vcmp.gt.f32.partialorder %v1361_v53, 0.0  ;;  %v1489_v47 = vmul.f32 0.01, %v1361_v53  ;;  %v1393_v59 = vadd.f32 %v3093_v48, %v1323_v55  ;;  %v1366_v7 = vadd.f32 %v3093_v48, %v1296_v19  ;;  %v1229_v55 = vld [vmem:[#allocation2 + $0xf8] sm:$0xff] }
 0x13e   : > { %1905 = vst.msk [vmem:[%s2767_s9 + $0xd0] sm:$0xf] %vm1852_vm4, %v2238_v23  ;;  %v1555_v31 = vsel %vm1427_vm6, %v1363_v0, %v1491_v33  ;;  %v1398_v49 = vadd.f32 %v3093_v48, %v1328_v2  ;;  %v1294_v32 = vmul.f32 %v3082_v5, %v1222_v22  ;;  %v1587_v35 = vsel %vm1459_vm7, %v1395_v50, %v1523_v57 }
 0x13f   : > { %v2209_v1 = vpack.c.bf16 %v1555_v31, %v1555_v31  ;;  %v1553_v60 = vsel %vm1425_vm8, %v1361_v53, %v1489_v47  ;;  %vm1457_vm9 = vcmp.gt.f32.partialorder %v1393_v59, 0.0  ;;  %v2241_v8 = vpack.c.bf16 %v1587_v35, %v1587_v35 }
 0x140   : > { %v2207_v30 = vpack.c.bf16 %v1553_v60, %v1553_v60  ;;  %v1521_v58 = vmul.f32 0.01, %v1393_v59  ;;  %vm1430_vm10 = vcmp.gt.f32.partialorder %v1366_v7, 0.0  ;;  %v1494_v10 = vmul.f32 0.01, %v1366_v7 }
 0x141   : > { %1876 = vst.msk [vmem:[%s2767_s9 + $0x5c] sm:$0xf] %vm1852_vm4, %v2209_v1  ;;  %vm1462_vm11 = vcmp.gt.f32.partialorder %v1398_v49, 0.0  ;;  %v1526_v11 = vmul.f32 0.01, %v1398_v49  ;;  %v1364_v12 = vadd.f32 %v3093_v48, %v1294_v32  ;;  %v1326_v13 = vmul.f32 %v3082_v5, %v1254_v62  ;;  %v1227_v32 = vld [vmem:[#allocation2 + $0xe8] sm:$0xff] }
 0x142   : > { %1908 = vst.msk [vmem:[%s2767_s9 + $0xdc] sm:$0xf] %vm1852_vm4, %v2241_v8  ;;  %1874 = vst.msk [vmem:[%s2767_s9 + $0x54] sm:$0xf] %vm1852_vm4, %v2207_v30  ;;  %v1585_v41 = vsel %vm1457_vm9, %v1393_v59, %v1521_v58  ;;  %v1297_v14 = vmul.f32 %v3082_v5, %v1225_v63  ;;  %v1329_v15 = vmul.f32 %v3082_v5, %v1257_v3  ;;  %v1259_v1 = vld [vmem:[#allocation2 + $0x1e8] sm:$0xff] }
 0x143   : > { %v2239_v20 = vpack.c.bf16 %v1585_v41, %v1585_v41  ;;  %v1558_v9 = vsel %vm1430_vm10, %v1366_v7, %v1494_v10  ;;  %v1590_v21 = vsel %vm1462_vm11, %v1398_v49, %v1526_v11  ;;  %vm1428_vm12 = vcmp.gt.f32.partialorder %v1364_v12, 0.0  ;;  %v1261_v49 = vld [vmem:[#allocation2 + $0x1f8] sm:$0xff] }
 0x144   : > { %v2212_v24 = vpack.c.bf16 %v1558_v9, %v1558_v9  ;;  %v2244_v25 = vpack.c.bf16 %v1590_v21, %v1590_v21  ;;  %v1492_v28 = vmul.f32 0.01, %v1364_v12  ;;  %v1396_v29 = vadd.f32 %v3093_v48, %v1326_v13 }
 0x145   : > { %1906 = vst.msk [vmem:[%s2767_s9 + $0xd4] sm:$0xf] %vm1852_vm4, %v2239_v20  ;;  %v1367_v34 = vadd.f32 %v3093_v48, %v1297_v14  ;;  %v1399_v56 = vadd.f32 %v3093_v48, %v1329_v15  ;;  %v1295_v42 = vmul.f32 %v3082_v5, %v1223_v16  ;;  %v1327_v52 = vmul.f32 %v3082_v5, %v1255_v17 }
 0x146   : > { %1879 = vst.msk [vmem:[%s2767_s9 + $0x68] sm:$0xf] %vm1852_vm4, %v2212_v24  ;;  %1911 = vst.msk [vmem:[%s2767_s9 + $0xe8] sm:$0xf] %vm1852_vm4, %v2244_v25  ;;  %v1556_v36 = vsel %vm1428_vm12, %v1364_v12, %v1492_v28  ;;  %vm1460_vm13 = vcmp.gt.f32.partialorder %v1396_v29, 0.0  ;;  %v1300_v38 = vmul.f32 %v3082_v5, %v1228_v4  ;;  %v1332_v18 = vmul.f32 %v3082_v5, %v1260_v61 }
 0x147   : > { %v1524_v37 = vmul.f32 0.01, %v1396_v29  ;;  %v2210_v39 = vpack.c.bf16 %v1556_v36, %v1556_v36  ;;  %vm1431_vm14 = vcmp.gt.f32.partialorder %v1367_v34, 0.0  ;;  %v1495_v40 = vmul.f32 0.01, %v1367_v34 }
 0x148   : > { %vm1463_vm15 = vcmp.gt.f32.partialorder %v1399_v56, 0.0  ;;  %v1527_v43 = vmul.f32 0.01, %v1399_v56  ;;  %v1365_v44 = vadd.f32 %v3093_v48, %v1295_v42  ;;  %v1397_v45 = vadd.f32 %v3093_v48, %v1327_v52 }
 0x149   : > { %v1588_v6 = vsel %vm1460_vm13, %v1396_v29, %v1524_v37  ;;  %1877 = vst.msk [vmem:[%s2767_s9 + $0x60] sm:$0xf] %vm1852_vm4, %v2210_v39  ;;  %v1559_v26 = vsel %vm1431_vm14, %v1367_v34, %v1495_v40  ;;  %v1370_v27 = vadd.f32 %v3093_v48, %v1300_v38  ;;  %v1402_v33 = vadd.f32 %v3093_v48, %v1332_v18 }
 0x14a   : > { %v2242_v51 = vpack.c.bf16 %v1588_v6, %v1588_v6  ;;  %v2213_v0 = vpack.c.bf16 %v1559_v26, %v1559_v26  ;;  %v1591_v50 = vsel %vm1463_vm15, %v1399_v56, %v1527_v43  ;;  %vm1429_vm0 = vcmp.gt.f32.partialorder %v1365_v44, 0.0 }
 0x14b   : > { %v1493_v53 = vmul.f32 0.01, %v1365_v44  ;;  %v2245_v19 = vpack.c.bf16 %v1591_v50, %v1591_v50  ;;  %vm1461_vm1 = vcmp.gt.f32.partialorder %v1397_v45, 0.0  ;;  %v1525_v2 = vmul.f32 0.01, %v1397_v45 }
 0x14c   : > { %1909 = vst.msk [vmem:[%s2767_s9 + $0xe0] sm:$0xf] %vm1852_vm4, %v2242_v51  ;;  %vm1434_vm2 = vcmp.gt.f32.partialorder %v1370_v27, 0.0  ;;  %1880 = vst.msk [vmem:[%s2767_s9 + $0x6c] sm:$0xf] %vm1852_vm4, %v2213_v0  ;;  %v1298_v57 = vmul.f32 %v3082_v5, %v1226_v46  ;;  %v1330_v31 = vmul.f32 %v3082_v5, %v1258_v54  ;;  %v1301_v7 = vmul.f32 %v3082_v5, %v1229_v55 }
 0x14d   : > { %v1557_v22 = vsel %vm1429_vm0, %v1365_v44, %v1493_v53  ;;  %v1498_v23 = vmul.f32 0.01, %v1370_v27  ;;  %1912 = vst.msk [vmem:[%s2767_s9 + $0xec] sm:$0xf] %vm1852_vm4, %v2245_v19  ;;  %v1589_v59 = vsel %vm1461_vm1, %v1397_v45, %v1525_v2  ;;  %vm1466_vm3 = vcmp.gt.f32.partialorder %v1402_v33, 0.0 }
 0x14e   : > { %v2211_v47 = vpack.c.bf16 %v1557_v22, %v1557_v22  ;;  %v2243_v35 = vpack.c.bf16 %v1589_v59, %v1589_v59  ;;  %v1530_v62 = vmul.f32 0.01, %v1402_v33  ;;  %v1368_v3 = vadd.f32 %v3093_v48, %v1298_v57 }
 0x14f   : > { %v1562_v60 = vsel %vm1434_vm2, %v1370_v27, %v1498_v23  ;;  %v1400_v8 = vadd.f32 %v3093_v48, %v1330_v31  ;;  %v1371_v30 = vadd.f32 %v3093_v48, %v1301_v7  ;;  %v1333_v10 = vmul.f32 %v3082_v5, %v1261_v49 }
 0x150   : > { %1878 = vst.msk [vmem:[%s2767_s9 + $0x64] sm:$0xf] %vm1852_vm4, %v2211_v47  ;;  %v2216_v63 = vpack.c.bf16 %v1562_v60, %v1562_v60  ;;  %1910 = vst.msk [vmem:[%s2767_s9 + $0xe4] sm:$0xf] %vm1852_vm4, %v2243_v35  ;;  %v1594_v58 = vsel %vm1466_vm3, %v1402_v33, %v1530_v62  ;;  %v1299_v11 = vmul.f32 %v3082_v5, %v1227_v32  ;;  %vm1432_vm5 = vcmp.gt.f32.partialorder %v1368_v3, 0.0 }
 0x151   : > { %v1331_v12 = vmul.f32 %v3082_v5, %v1259_v1  ;;  %v2248_v41 = vpack.c.bf16 %v1594_v58, %v1594_v58  ;;  %v1496_v13 = vmul.f32 0.01, %v1368_v3  ;;  %vm1464_vm6 = vcmp.gt.f32.partialorder %v1400_v8, 0.0 }
 0x152   : > { %1883 = vst.msk [vmem:[%s2767_s9 + $0x78] sm:$0xf] %vm1852_vm4, %v2216_v63  ;;  %v1528_v14 = vmul.f32 0.01, %v1400_v8  ;;  %vm1435_vm7 = vcmp.gt.f32.partialorder %v1371_v30, 0.0  ;;  %v1403_v16 = vadd.f32 %v3093_v48, %v1333_v10  ;;  %v1369_v20 = vadd.f32 %v3093_v48, %v1299_v11 }
 0x153   : > { %v1499_v15 = vmul.f32 0.01, %v1371_v30  ;;  %1915 = vst.msk [vmem:[%s2767_s9 + $0xf8] sm:$0xf] %vm1852_vm4, %v2248_v41  ;;  %v1560_v17 = vsel %vm1432_vm5, %v1368_v3, %v1496_v13  ;;  %v1401_v5 = vadd.f32 %v3093_v48, %v1331_v12 }
 0x154   : > { %v2214_v9 = vpack.c.bf16 %v1560_v17, %v1560_v17  ;;  %v1592_v21 = vsel %vm1464_vm6, %v1400_v8, %v1528_v14  ;;  %vm1467_vm8 = vcmp.gt.f32.partialorder %v1403_v16, 0.0  ;;  %v1531_v28 = vmul.f32 0.01, %v1403_v16 }
 0x155   : > { %v1563_v4 = vsel %vm1435_vm7, %v1371_v30, %v1499_v15  ;;  %v2246_v24 = vpack.c.bf16 %v1592_v21, %v1592_v21  ;;  %vm1433_vm9 = vcmp.gt.f32.partialorder %v1369_v20, 0.0  ;;  %v1497_v29 = vmul.f32 0.01, %v1369_v20 }
 0x156   : > { %v2217_v25 = vpack.c.bf16 %v1563_v4, %v1563_v4  ;;  %1881 = vst.msk [vmem:[%s2767_s9 + $0x70] sm:$0xf] %vm1852_vm4, %v2214_v9  ;;  %vm1465_vm10 = vcmp.gt.f32.partialorder %v1401_v5, 0.0  ;;  %v1529_v34 = vmul.f32 0.01, %v1401_v5  ;;  %v1595_v48 = vsel %vm1467_vm8, %v1403_v16, %v1531_v28 }
 0x157   : > { %1913 = vst.msk [vmem:[%s2767_s9 + $0xf0] sm:$0xf] %vm1852_vm4, %v2246_v24  ;;  %v2249_v56 = vpack.c.bf16 %v1595_v48, %v1595_v48  ;;  %v1561_v42 = vsel %vm1433_vm9, %v1369_v20, %v1497_v29 }
 0x158   : > { %1884 = vst.msk [vmem:[%s2767_s9 + $0x7c] sm:$0xf] %vm1852_vm4, %v2217_v25  ;;  %v1593_v52 = vsel %vm1465_vm10, %v1401_v5, %v1529_v34  ;;  %v2215_v36 = vpack.c.bf16 %v1561_v42, %v1561_v42 }
 0x159   : > { %v2247_v37 = vpack.c.bf16 %v1593_v52, %v1593_v52  ;;  %1916 = vst.msk [vmem:[%s2767_s9 + $0xfc] sm:$0xf] %vm1852_vm4, %v2249_v56 }
 0x15a   : > { %1882 = vst.msk [vmem:[%s2767_s9 + $0x74] sm:$0xf] %vm1852_vm4, %v2215_v36 }
 0x15b   : > { %1914 = vst.msk [vmem:[%s2767_s9 + $0xf4] sm:$0xf] %vm1852_vm4, %v2247_v37 }
 0x15c PF: > { %s14_s17 = sadd.s32 1, %s2440_s17   ;;  %s3220_s15 = smov %s2436_s16 }
 0x15d   : > { %p11_p5 = scmp.ge.s32.totalorder %s14_s17, 18   ;;  %s3221_s16 = smov %s3223_s18 }
 0x15f   :  { %13 = sbr.rel (!%p11_p5) target bundleno = 2 (0x2), region = 83 }

</bundles_post_ra>
